<compile_context>
chip_gen: v7x
topology: tpu7x:2x2x1
jax: 0.10.0
libtpu: 0.0.40
codegen_flags: <defaults>
</compile_context>

<pallas_src>
import functools

import jax
import jax.numpy as jnp
from jax import lax
from jax.experimental import pallas as pl
from jax.experimental.pallas import tpu as pltpu


def _round_up(x, m):
    return (x + m - 1) // m * m


def _pick_strip_rows(h, max_rows=64):
    """Largest divisor of h that is <= max_rows (output rows per strip)."""
    hs = min(h, max_rows)
    while h % hs:
        hs -= 1
    return hs


def _rebnconv_kernel(x_ref, w_ref, b_ref, o_ref, acc_ref, *, Hs, W, Wp, d):
    """One (batch, row-strip) tile per grid step.

    x_ref:   (1, (Hs + 2d + 1) * Wp, Cin)  bf16, row-flattened padded strip
    w_ref:   (3, 3, Cin, Cout_p)           bf16, BN scale pre-folded
    b_ref:   (1, Cout_p)                   f32, folded conv + BN bias
    o_ref:   (1, Hs, W, Cout_p)            f32
    acc_ref: (Hs * Wp, Cout_p)             f32 VMEM scratch accumulator
    """
    cout = o_ref.shape[-1]
    M = Hs * Wp                  # output pixels per strip (at padded width)
    L = (Hs + 2 * d) * Wp        # rows touched across all kh taps

    # Start the accumulator at the folded bias (saves an epilogue add).
    acc_ref[...] = jnp.broadcast_to(b_ref[...], (M, cout))

    # Hoist the three kw column shifts (the only misaligned accesses) out of
    # the tap loop; the kh taps below are row-aligned slices of these slabs.
    x_shift = [x_ref[0, kw * d:kw * d + L, :] for kw in range(3)]

    # 3x3 dilated conv: 9 accumulated MXU matmuls over full padded-width rows.
    for kh in range(3):
        row_off = kh * d * Wp
        for kw in range(3):
            xk = x_shift[kw][row_off:row_off + M, :]          # (M, Cin) bf16
            acc_ref[...] += jnp.dot(xk, w_ref[kh, kw],
                                    preferred_element_type=jnp.float32)

    # Crop the padded columns, ReLU, and store lane-dense (Cout_p = k * 128).
    y = acc_ref[...].reshape(Hs, Wp, cout)[:, :W, :]
    o_ref[...] = jnp.maximum(y, 0.0)[None].astype(o_ref.dtype)


def rebnconv_pallas(x_nchw, weight_hwio, conv_bias, gamma, beta,
                    running_mean, running_var, *, dirate=1, eps=1e-5,
                    max_strip_rows=64):
    """(N, Cin, H, W) f32 -> (N, Cout, H, W) f32: Conv3x3(dirate) + BN(eval) + ReLU."""
    N, Cin, H, W = x_nchw.shape
    Cout = weight_hwio.shape[-1]
    d = int(dirate)

    # Compile-time geometry.
    Hs = _pick_strip_rows(H, max_strip_rows)   # output rows per strip
    S = H // Hs
    NS = N * S
    Wp = _round_up(W + 2 * d, 16)   # padded width, bf16-sublane aligned
    Hp_s = Hs + 2 * d + 1           # halo rows + 1 spare row for the last tap's overhang
    Cout_p = _round_up(Cout, 128)   # lane-dense output channels

    f32 = jnp.float32
    # Fold conv bias + eval-mode BN into per-channel scale/bias, then fold the
    # scale into the conv weights.
    inv_std = lax.rsqrt(running_var.astype(f32) + eps)
    scale = gamma.astype(f32) * inv_std                                   # (Cout,)
    bias = (beta.astype(f32) - running_mean.astype(f32) * scale
            + conv_bias.astype(f32) * scale)                              # (Cout,)
    w_f = weight_hwio.astype(f32) * scale[None, None, None, :]
    w_f = jnp.pad(w_f, ((0, 0), (0, 0), (0, 0), (0, Cout_p - Cout)))
    w_f = w_f.astype(jnp.bfloat16)                                        # (3,3,Cin,Cout_p)
    bias_p = jnp.pad(bias, (0, Cout_p - Cout)).reshape(1, Cout_p)         # (1,Cout_p) f32

    # Activation prep: NCHW -> NHWC, zero pad, bf16, row-strip, flatten rows.
    # TODO(synk): this prep is one extra HBM pass over the activations; it
    # could be removed by masking the borders in-kernel (or pl.Element halo
    # blocks) if profiles show it matters.
    x_nhwc = jnp.transpose(x_nchw, (0, 2, 3, 1)).astype(f32)
    x_pad = jnp.pad(x_nhwc, ((0, 0), (d, d + 1), (d, Wp - W - d), (0, 0)))
    x_pad = x_pad.astype(jnp.bfloat16)                  # (N, H + 2d + 1, Wp, Cin)
    if S == 1:
        x_strips = x_pad
    else:
        rows = jnp.arange(S)[:, None] * Hs + jnp.arange(Hp_s)[None, :]
        x_strips = x_pad[:, rows]                       # (N, S, Hp_s, Wp, Cin)
    x_flat = x_strips.reshape(NS, Hp_s * Wp, Cin)

    kernel = functools.partial(_rebnconv_kernel, Hs=Hs, W=W, Wp=Wp, d=d)
    flops = 2 * NS * Hs * Wp * 9 * Cin * Cout_p
    bytes_accessed = (x_flat.size * 2 + w_f.size * 2 + bias_p.size * 4
                      + NS * Hs * W * Cout_p * 4)

    out = pl.pallas_call(
        kernel,
        out_shape=jax.ShapeDtypeStruct((NS, Hs, W, Cout_p), f32),
        grid_spec=pltpu.PrefetchScalarGridSpec(
            num_scalar_prefetch=0,
            grid=(NS,),
            in_specs=[
                pl.BlockSpec((1, Hp_s * Wp, Cin), lambda i: (i, 0, 0)),
                pl.BlockSpec((3, 3, Cin, Cout_p), lambda i: (0, 0, 0, 0)),
                pl.BlockSpec((1, Cout_p), lambda i: (0, 0)),
            ],
            out_specs=pl.BlockSpec((1, Hs, W, Cout_p), lambda i: (i, 0, 0, 0)),
            scratch_shapes=[pltpu.VMEM((Hs * Wp, Cout_p), f32)],
        ),
        compiler_params=pltpu.CompilerParams(
            dimension_semantics=("parallel",)),
        cost_estimate=pl.CostEstimate(flops=flops, transcendentals=0,
                                      bytes_accessed=bytes_accessed),
    )(x_flat, w_f, bias_p)

    out = out[..., :Cout].reshape(N, H, W, Cout)
    return jnp.transpose(out, (0, 3, 1, 2))


def _reference_bf16(x_nchw, weight_hwio, conv_bias, gamma, beta,
                    running_mean, running_var, *, dirate=1, eps=1e-5):
    """Pure-JAX reference mirroring the kernel's precision choices."""
    f32 = jnp.float32
    inv_std = lax.rsqrt(running_var.astype(f32) + eps)
    scale = gamma.astype(f32) * inv_std
    bias = (beta.astype(f32) - running_mean.astype(f32) * scale
            + conv_bias.astype(f32) * scale)
    w_eff = (weight_hwio.astype(f32) * scale).astype(jnp.bfloat16).astype(f32)
    x_nhwc = jnp.transpose(x_nchw, (0, 2, 3, 1)).astype(jnp.bfloat16).astype(f32)
    y = lax.conv_general_dilated(
        x_nhwc, w_eff, window_strides=(1, 1),
        padding=[(dirate, dirate), (dirate, dirate)],
        rhs_dilation=(dirate, dirate),
        dimension_numbers=("NHWC", "HWIO", "NHWC"),
        precision=lax.Precision.HIGHEST)
    y = jnp.maximum(y + bias, 0.0)
    return jnp.transpose(y, (0, 3, 1, 2))


def _reference_f32(x_nchw, weight_hwio, conv_bias, gamma, beta,
                   running_mean, running_var, *, dirate=1, eps=1e-5):
    """Full-precision reference matching the PyTorch module (eval mode)."""
    w_oihw = jnp.transpose(weight_hwio, (3, 2, 0, 1))
    y = lax.conv_general_dilated(
        x_nchw, w_oihw, window_strides=(1, 1),
        padding=[(dirate, dirate), (dirate, dirate)],
        rhs_dilation=(dirate, dirate),
        dimension_numbers=("NCHW", "OIHW", "NCHW"),
        precision=lax.Precision.HIGHEST)
    y = y + conv_bias[None, :, None, None]
    inv_std = 1.0 / jnp.sqrt(running_var + eps)
    y = ((y - running_mean[None, :, None, None])
         * (gamma * inv_std)[None, :, None, None] + beta[None, :, None, None])
    return jnp.maximum(y, 0.0)


if __name__ == "__main__":
    key = jax.random.PRNGKey(0)
    k_x, k_w, k_b, k_g, k_be, k_m, k_v = jax.random.split(key, 7)

    N, Cin, Cout, H, W = 2, 4, 8, 16, 16
    dirate = 1

    x = jax.random.normal(k_x, (N, Cin, H, W), dtype=jnp.float32)
    weight = jax.random.normal(k_w, (3, 3, Cin, Cout), dtype=jnp.float32) * 0.1
    conv_bias = jax.random.normal(k_b, (Cout,), dtype=jnp.float32) * 0.05
    gamma = 1.0 + 0.1 * jax.random.normal(k_g, (Cout,), dtype=jnp.float32)
    beta = 0.1 * jax.random.normal(k_be, (Cout,), dtype=jnp.float32)
    running_mean = 0.1 * jax.random.normal(k_m, (Cout,), dtype=jnp.float32)
    running_var = 1.0 + 0.1 * jax.random.uniform(k_v, (Cout,), dtype=jnp.float32)

    out = rebnconv_pallas(x, weight, conv_bias, gamma, beta,
                          running_mean, running_var, dirate=dirate)
    out = jax.block_until_ready(out)
    assert out.shape == (N, Cout, H, W)

    ref16 = _reference_bf16(x, weight, conv_bias, gamma, beta,
                            running_mean, running_var, dirate=dirate)
    assert jnp.allclose(out, ref16, atol=2e-3, rtol=2e-3), \
        "mismatch vs precision-matched reference"

    ref32 = _reference_f32(x, weight, conv_bias, gamma, beta,
                           running_mean, running_var, dirate=dirate)
    assert jnp.allclose(out, ref32, atol=1e-1, rtol=1e-1), \
        "mismatch vs f32 module reference"

    print("KERNEL_OK")
</pallas_src>

<mosaic_0001>
module attributes {stable_mosaic.version = 11 : i64} {
  func.func @_rebnconv_kernel(%arg0: i32, %arg1: memref<1x608x4xbf16, #tpu.memory_space<vmem>>, %arg2: memref<3x3x4x128xbf16, #tpu.memory_space<vmem>>, %arg3: memref<1x128xf32, #tpu.memory_space<vmem>>, %arg4: memref<1x16x16x128xf32, #tpu.memory_space<vmem>>, %arg5: memref<512x128xf32, #tpu.memory_space<vmem>>) attributes {dimension_semantics = [#tpu.dimension_semantics<parallel>], iteration_bounds = array<i64: 2>, scalar_prefetch = 0 : i64, scratch_operands = 1 : i64, tpu.core_type = #tpu.core_type<tc>, window_params = [{transform_indices = @transform_0, window_bounds = array<i64: 1, 608, 4>}, {pipeline_mode = #tpu.pipeline_mode<synchronous>, transform_indices = @transform_1, window_bounds = array<i64: 3, 3, 4, 128>}, {pipeline_mode = #tpu.pipeline_mode<synchronous>, transform_indices = @transform_2, window_bounds = array<i64: 1, 128>}, {transform_indices = @transform_3, window_bounds = array<i64: 1, 16, 16, 128>}]} {
    %c0 = arith.constant 0 : index
    %c0_0 = arith.constant 0 : index
    %0 = vector.load %arg3[%c0, %c0_0] : memref<1x128xf32, #tpu.memory_space<vmem>>, vector<1x128xf32>
    %1 = vector.shape_cast %0 : vector<1x128xf32> to vector<1x128xf32>
    %2 = vector.broadcast %1 : vector<1x128xf32> to vector<512x128xf32>
    %c0_1 = arith.constant 0 : index
    %c0_2 = arith.constant 0 : index
    %3 = vector.load %arg5[%c0_1, %c0_2] : memref<512x128xf32, #tpu.memory_space<vmem>>, vector<512x128xf32>
    tpu.vector_store %arg5[%c0_1, %c0_2], %2 {strides = array<i32>} : memref<512x128xf32, #tpu.memory_space<vmem>>, vector<512x128xf32>,
    %c0_3 = arith.constant 0 : index
    %c0_4 = arith.constant 0 : index
    %c0_5 = arith.constant 0 : index
    %4 = vector.load %arg1[%c0_3, %c0_4, %c0_5] : memref<1x608x4xbf16, #tpu.memory_space<vmem>>, vector<1x576x4xbf16>
    %5 = vector.shape_cast %4 : vector<1x576x4xbf16> to vector<576x4xbf16>
    %c0_6 = arith.constant 0 : index
    %c1 = arith.constant 1 : index
    %c0_7 = arith.constant 0 : index
    %6 = vector.load %arg1[%c0_6, %c1, %c0_7] : memref<1x608x4xbf16, #tpu.memory_space<vmem>>, vector<1x576x4xbf16>
    %7 = vector.shape_cast %6 : vector<1x576x4xbf16> to vector<576x4xbf16>
    %c0_8 = arith.constant 0 : index
    %c2 = arith.constant 2 : index
    %c0_9 = arith.constant 0 : index
    %8 = vector.load %arg1[%c0_8, %c2, %c0_9] : memref<1x608x4xbf16, #tpu.memory_space<vmem>>, vector<1x576x4xbf16>
    %9 = vector.shape_cast %8 : vector<1x576x4xbf16> to vector<576x4xbf16>
    %10 = vector.extract_strided_slice %5 {offsets = [0, 0], sizes = [512, 4], strides = [1, 1]} : vector<576x4xbf16> to vector<512x4xbf16>
    %c0_10 = arith.constant 0 : index
    %c0_11 = arith.constant 0 : index
    %11 = vector.load %arg5[%c0_10, %c0_11] : memref<512x128xf32, #tpu.memory_space<vmem>>, vector<512x128xf32>
    %c0_12 = arith.constant 0 : index
    %c0_13 = arith.constant 0 : index
    %c0_14 = arith.constant 0 : index
    %c0_15 = arith.constant 0 : index
    %12 = vector.load %arg2[%c0_12, %c0_13, %c0_14, %c0_15] : memref<3x3x4x128xbf16, #tpu.memory_space<vmem>>, vector<1x1x4x128xbf16>
    %13 = vector.shape_cast %12 : vector<1x1x4x128xbf16> to vector<4x128xbf16>
    %cst = arith.constant dense<0.000000e+00> : vector<512x128xf32>
    %14 = tpu.matmul %10, %13, %cst {dimension_numbers = #tpu.dot_dimension_numbers<[1], [0], [0], [1], [0, 0, 1, 1], [], []>} : vector<512x4xbf16>, vector<4x128xbf16>, vector<512x128xf32> -> vector<512x128xf32>
    %15 = arith.addf %11, %14 : vector<512x128xf32>
    %c0_16 = arith.constant 0 : index
    %c0_17 = arith.constant 0 : index
    %16 = vector.load %arg5[%c0_16, %c0_17] : memref<512x128xf32, #tpu.memory_space<vmem>>, vector<512x128xf32>
    tpu.vector_store %arg5[%c0_16, %c0_17], %15 {strides = array<i32>} : memref<512x128xf32, #tpu.memory_space<vmem>>, vector<512x128xf32>,
    %17 = vector.extract_strided_slice %7 {offsets = [0, 0], sizes = [512, 4], strides = [1, 1]} : vector<576x4xbf16> to vector<512x4xbf16>
    %c0_18 = arith.constant 0 : index
    %c0_19 = arith.constant 0 : index
    %18 = vector.load %arg5[%c0_18, %c0_19] : memref<512x128xf32, #tpu.memory_space<vmem>>, vector<512x128xf32>
    %c0_20 = arith.constant 0 : index
    %c1_21 = arith.constant 1 : index
    %c0_22 = arith.constant 0 : index
    %c0_23 = arith.constant 0 : index
    %19 = vector.load %arg2[%c0_20, %c1_21, %c0_22, %c0_23] : memref<3x3x4x128xbf16, #tpu.memory_space<vmem>>, vector<1x1x4x128xbf16>
    %20 = vector.shape_cast %19 : vector<1x1x4x128xbf16> to vector<4x128xbf16>
    %cst_24 = arith.constant dense<0.000000e+00> : vector<512x128xf32>
    %21 = tpu.matmul %17, %20, %cst_24 {dimension_numbers = #tpu.dot_dimension_numbers<[1], [0], [0], [1], [0, 0, 1, 1], [], []>} : vector<512x4xbf16>, vector<4x128xbf16>, vector<512x128xf32> -> vector<512x128xf32>
    %22 = arith.addf %18, %21 : vector<512x128xf32>
    %c0_25 = arith.constant 0 : index
    %c0_26 = arith.constant 0 : index
    %23 = vector.load %arg5[%c0_25, %c0_26] : memref<512x128xf32, #tpu.memory_space<vmem>>, vector<512x128xf32>
    tpu.vector_store %arg5[%c0_25, %c0_26], %22 {strides = array<i32>} : memref<512x128xf32, #tpu.memory_space<vmem>>, vector<512x128xf32>,
    %24 = vector.extract_strided_slice %9 {offsets = [0, 0], sizes = [512, 4], strides = [1, 1]} : vector<576x4xbf16> to vector<512x4xbf16>
    %c0_27 = arith.constant 0 : index
    %c0_28 = arith.constant 0 : index
    %25 = vector.load %arg5[%c0_27, %c0_28] : memref<512x128xf32, #tpu.memory_space<vmem>>, vector<512x128xf32>
    %c0_29 = arith.constant 0 : index
    %c2_30 = arith.constant 2 : index
    %c0_31 = arith.constant 0 : index
    %c0_32 = arith.constant 0 : index
    %26 = vector.load %arg2[%c0_29, %c2_30, %c0_31, %c0_32] : memref<3x3x4x128xbf16, #tpu.memory_space<vmem>>, vector<1x1x4x128xbf16>
    %27 = vector.shape_cast %26 : vector<1x1x4x128xbf16> to vector<4x128xbf16>
    %cst_33 = arith.constant dense<0.000000e+00> : vector<512x128xf32>
    %28 = tpu.matmul %24, %27, %cst_33 {dimension_numbers = #tpu.dot_dimension_numbers<[1], [0], [0], [1], [0, 0, 1, 1], [], []>} : vector<512x4xbf16>, vector<4x128xbf16>, vector<512x128xf32> -> vector<512x128xf32>
    %29 = arith.addf %25, %28 : vector<512x128xf32>
    %c0_34 = arith.constant 0 : index
    %c0_35 = arith.constant 0 : index
    %30 = vector.load %arg5[%c0_34, %c0_35] : memref<512x128xf32, #tpu.memory_space<vmem>>, vector<512x128xf32>
    tpu.vector_store %arg5[%c0_34, %c0_35], %29 {strides = array<i32>} : memref<512x128xf32, #tpu.memory_space<vmem>>, vector<512x128xf32>,
    %31 = vector.extract_strided_slice %5 {offsets = [32, 0], sizes = [512, 4], strides = [1, 1]} : vector<576x4xbf16> to vector<512x4xbf16>
    %c0_36 = arith.constant 0 : index
    %c0_37 = arith.constant 0 : index
    %32 = vector.load %arg5[%c0_36, %c0_37] : memref<512x128xf32, #tpu.memory_space<vmem>>, vector<512x128xf32>
    %c1_38 = arith.constant 1 : index
    %c0_39 = arith.constant 0 : index
    %c0_40 = arith.constant 0 : index
    %c0_41 = arith.constant 0 : index
    %33 = vector.load %arg2[%c1_38, %c0_39, %c0_40, %c0_41] : memref<3x3x4x128xbf16, #tpu.memory_space<vmem>>, vector<1x1x4x128xbf16>
    %34 = vector.shape_cast %33 : vector<1x1x4x128xbf16> to vector<4x128xbf16>
    %cst_42 = arith.constant dense<0.000000e+00> : vector<512x128xf32>
    %35 = tpu.matmul %31, %34, %cst_42 {dimension_numbers = #tpu.dot_dimension_numbers<[1], [0], [0], [1], [0, 0, 1, 1], [], []>} : vector<512x4xbf16>, vector<4x128xbf16>, vector<512x128xf32> -> vector<512x128xf32>
    %36 = arith.addf %32, %35 : vector<512x128xf32>
    %c0_43 = arith.constant 0 : index
    %c0_44 = arith.constant 0 : index
    %37 = vector.load %arg5[%c0_43, %c0_44] : memref<512x128xf32, #tpu.memory_space<vmem>>, vector<512x128xf32>
    tpu.vector_store %arg5[%c0_43, %c0_44], %36 {strides = array<i32>} : memref<512x128xf32, #tpu.memory_space<vmem>>, vector<512x128xf32>,
    %38 = vector.extract_strided_slice %7 {offsets = [32, 0], sizes = [512, 4], strides = [1, 1]} : vector<576x4xbf16> to vector<512x4xbf16>
    %c0_45 = arith.constant 0 : index
    %c0_46 = arith.constant 0 : index
    %39 = vector.load %arg5[%c0_45, %c0_46] : memref<512x128xf32, #tpu.memory_space<vmem>>, vector<512x128xf32>
    %c1_47 = arith.constant 1 : index
    %c1_48 = arith.constant 1 : index
    %c0_49 = arith.constant 0 : index
    %c0_50 = arith.constant 0 : index
    %40 = vector.load %arg2[%c1_47, %c1_48, %c0_49, %c0_50] : memref<3x3x4x128xbf16, #tpu.memory_space<vmem>>, vector<1x1x4x128xbf16>
    %41 = vector.shape_cast %40 : vector<1x1x4x128xbf16> to vector<4x128xbf16>
    %cst_51 = arith.constant dense<0.000000e+00> : vector<512x128xf32>
    %42 = tpu.matmul %38, %41, %cst_51 {dimension_numbers = #tpu.dot_dimension_numbers<[1], [0], [0], [1], [0, 0, 1, 1], [], []>} : vector<512x4xbf16>, vector<4x128xbf16>, vector<512x128xf32> -> vector<512x128xf32>
    %43 = arith.addf %39, %42 : vector<512x128xf32>
    %c0_52 = arith.constant 0 : index
    %c0_53 = arith.constant 0 : index
    %44 = vector.load %arg5[%c0_52, %c0_53] : memref<512x128xf32, #tpu.memory_space<vmem>>, vector<512x128xf32>
    tpu.vector_store %arg5[%c0_52, %c0_53], %43 {strides = array<i32>} : memref<512x128xf32, #tpu.memory_space<vmem>>, vector<512x128xf32>,
    %45 = vector.extract_strided_slice %9 {offsets = [32, 0], sizes = [512, 4], strides = [1, 1]} : vector<576x4xbf16> to vector<512x4xbf16>
    %c0_54 = arith.constant 0 : index
    %c0_55 = arith.constant 0 : index
    %46 = vector.load %arg5[%c0_54, %c0_55] : memref<512x128xf32, #tpu.memory_space<vmem>>, vector<512x128xf32>
    %c1_56 = arith.constant 1 : index
    %c2_57 = arith.constant 2 : index
    %c0_58 = arith.constant 0 : index
    %c0_59 = arith.constant 0 : index
    %47 = vector.load %arg2[%c1_56, %c2_57, %c0_58, %c0_59] : memref<3x3x4x128xbf16, #tpu.memory_space<vmem>>, vector<1x1x4x128xbf16>
    %48 = vector.shape_cast %47 : vector<1x1x4x128xbf16> to vector<4x128xbf16>
    %cst_60 = arith.constant dense<0.000000e+00> : vector<512x128xf32>
    %49 = tpu.matmul %45, %48, %cst_60 {dimension_numbers = #tpu.dot_dimension_numbers<[1], [0], [0], [1], [0, 0, 1, 1], [], []>} : vector<512x4xbf16>, vector<4x128xbf16>, vector<512x128xf32> -> vector<512x128xf32>
    %50 = arith.addf %46, %49 : vector<512x128xf32>
    %c0_61 = arith.constant 0 : index
    %c0_62 = arith.constant 0 : index
    %51 = vector.load %arg5[%c0_61, %c0_62] : memref<512x128xf32, #tpu.memory_space<vmem>>, vector<512x128xf32>
    tpu.vector_store %arg5[%c0_61, %c0_62], %50 {strides = array<i32>} : memref<512x128xf32, #tpu.memory_space<vmem>>, vector<512x128xf32>,
    %52 = vector.extract_strided_slice %5 {offsets = [64, 0], sizes = [512, 4], strides = [1, 1]} : vector<576x4xbf16> to vector<512x4xbf16>
    %c0_63 = arith.constant 0 : index
    %c0_64 = arith.constant 0 : index
    %53 = vector.load %arg5[%c0_63, %c0_64] : memref<512x128xf32, #tpu.memory_space<vmem>>, vector<512x128xf32>
    %c2_65 = arith.constant 2 : index
    %c0_66 = arith.constant 0 : index
    %c0_67 = arith.constant 0 : index
    %c0_68 = arith.constant 0 : index
    %54 = vector.load %arg2[%c2_65, %c0_66, %c0_67, %c0_68] : memref<3x3x4x128xbf16, #tpu.memory_space<vmem>>, vector<1x1x4x128xbf16>
    %55 = vector.shape_cast %54 : vector<1x1x4x128xbf16> to vector<4x128xbf16>
    %cst_69 = arith.constant dense<0.000000e+00> : vector<512x128xf32>
    %56 = tpu.matmul %52, %55, %cst_69 {dimension_numbers = #tpu.dot_dimension_numbers<[1], [0], [0], [1], [0, 0, 1, 1], [], []>} : vector<512x4xbf16>, vector<4x128xbf16>, vector<512x128xf32> -> vector<512x128xf32>
    %57 = arith.addf %53, %56 : vector<512x128xf32>
    %c0_70 = arith.constant 0 : index
    %c0_71 = arith.constant 0 : index
    %58 = vector.load %arg5[%c0_70, %c0_71] : memref<512x128xf32, #tpu.memory_space<vmem>>, vector<512x128xf32>
    tpu.vector_store %arg5[%c0_70, %c0_71], %57 {strides = array<i32>} : memref<512x128xf32, #tpu.memory_space<vmem>>, vector<512x128xf32>,
    %59 = vector.extract_strided_slice %7 {offsets = [64, 0], sizes = [512, 4], strides = [1, 1]} : vector<576x4xbf16> to vector<512x4xbf16>
    %c0_72 = arith.constant 0 : index
    %c0_73 = arith.constant 0 : index
    %60 = vector.load %arg5[%c0_72, %c0_73] : memref<512x128xf32, #tpu.memory_space<vmem>>, vector<512x128xf32>
    %c2_74 = arith.constant 2 : index
    %c1_75 = arith.constant 1 : index
    %c0_76 = arith.constant 0 : index
    %c0_77 = arith.constant 0 : index
    %61 = vector.load %arg2[%c2_74, %c1_75, %c0_76, %c0_77] : memref<3x3x4x128xbf16, #tpu.memory_space<vmem>>, vector<1x1x4x128xbf16>
    %62 = vector.shape_cast %61 : vector<1x1x4x128xbf16> to vector<4x128xbf16>
    %cst_78 = arith.constant dense<0.000000e+00> : vector<512x128xf32>
    %63 = tpu.matmul %59, %62, %cst_78 {dimension_numbers = #tpu.dot_dimension_numbers<[1], [0], [0], [1], [0, 0, 1, 1], [], []>} : vector<512x4xbf16>, vector<4x128xbf16>, vector<512x128xf32> -> vector<512x128xf32>
    %64 = arith.addf %60, %63 : vector<512x128xf32>
    %c0_79 = arith.constant 0 : index
    %c0_80 = arith.constant 0 : index
    %65 = vector.load %arg5[%c0_79, %c0_80] : memref<512x128xf32, #tpu.memory_space<vmem>>, vector<512x128xf32>
    tpu.vector_store %arg5[%c0_79, %c0_80], %64 {strides = array<i32>} : memref<512x128xf32, #tpu.memory_space<vmem>>, vector<512x128xf32>,
    %66 = vector.extract_strided_slice %9 {offsets = [64, 0], sizes = [512, 4], strides = [1, 1]} : vector<576x4xbf16> to vector<512x4xbf16>
    %c0_81 = arith.constant 0 : index
    %c0_82 = arith.constant 0 : index
    %67 = vector.load %arg5[%c0_81, %c0_82] : memref<512x128xf32, #tpu.memory_space<vmem>>, vector<512x128xf32>
    %c2_83 = arith.constant 2 : index
    %c2_84 = arith.constant 2 : index
    %c0_85 = arith.constant 0 : index
    %c0_86 = arith.constant 0 : index
    %68 = vector.load %arg2[%c2_83, %c2_84, %c0_85, %c0_86] : memref<3x3x4x128xbf16, #tpu.memory_space<vmem>>, vector<1x1x4x128xbf16>
    %69 = vector.shape_cast %68 : vector<1x1x4x128xbf16> to vector<4x128xbf16>
    %cst_87 = arith.constant dense<0.000000e+00> : vector<512x128xf32>
    %70 = tpu.matmul %66, %69, %cst_87 {dimension_numbers = #tpu.dot_dimension_numbers<[1], [0], [0], [1], [0, 0, 1, 1], [], []>} : vector<512x4xbf16>, vector<4x128xbf16>, vector<512x128xf32> -> vector<512x128xf32>
    %71 = arith.addf %67, %70 : vector<512x128xf32>
    %c0_88 = arith.constant 0 : index
    %c0_89 = arith.constant 0 : index
    %72 = vector.load %arg5[%c0_88, %c0_89] : memref<512x128xf32, #tpu.memory_space<vmem>>, vector<512x128xf32>
    tpu.vector_store %arg5[%c0_88, %c0_89], %71 {strides = array<i32>} : memref<512x128xf32, #tpu.memory_space<vmem>>, vector<512x128xf32>,
    %c0_90 = arith.constant 0 : index
    %c0_91 = arith.constant 0 : index
    %73 = vector.load %arg5[%c0_90, %c0_91] : memref<512x128xf32, #tpu.memory_space<vmem>>, vector<512x128xf32>
    %74 = vector.shape_cast %73 : vector<512x128xf32> to vector<16x32x128xf32>
    %75 = vector.extract_strided_slice %74 {offsets = [0, 0, 0], sizes = [16, 16, 128], strides = [1, 1, 1]} : vector<16x32x128xf32> to vector<16x16x128xf32>
    %cst_92 = arith.constant 0.000000e+00 : f32
    %76 = vector.broadcast %cst_92 : f32 to vector<16x16x128xf32>
    %77 = arith.maximumf %75, %76 : vector<16x16x128xf32>
    %78 = vector.shape_cast %77 : vector<16x16x128xf32> to vector<1x16x16x128xf32>
    %c0_93 = arith.constant 0 : index
    %c0_94 = arith.constant 0 : index
    %c0_95 = arith.constant 0 : index
    %c0_96 = arith.constant 0 : index
    %79 = vector.load %arg4[%c0_93, %c0_94, %c0_95, %c0_96] : memref<1x16x16x128xf32, #tpu.memory_space<vmem>>, vector<1x16x16x128xf32>
    tpu.vector_store %arg4[%c0_93, %c0_94, %c0_95, %c0_96], %78 {strides = array<i32>} : memref<1x16x16x128xf32, #tpu.memory_space<vmem>>, vector<1x16x16x128xf32>,
    return
  }
  func.func @transform_0(%arg0: i32) -> (i32, i32, i32) {
    %c0_i32 = arith.constant 0 : i32
    %c0_i32_0 = arith.constant 0 : i32
    %c0_i32_1 = arith.constant 0 : i32
    return %arg0, %c0_i32, %c0_i32_0 : i32, i32, i32
  }
  func.func @transform_1(%arg0: i32) -> (i32, i32, i32, i32) {
    %c0_i32 = arith.constant 0 : i32
    %c0_i32_0 = arith.constant 0 : i32
    %c0_i32_1 = arith.constant 0 : i32
    %c0_i32_2 = arith.constant 0 : i32
    %c0_i32_3 = arith.constant 0 : i32
    return %c0_i32, %c0_i32_0, %c0_i32_1, %c0_i32_2 : i32, i32, i32, i32
  }
  func.func @transform_2(%arg0: i32) -> (i32, i32) {
    %c0_i32 = arith.constant 0 : i32
    %c0_i32_0 = arith.constant 0 : i32
    %c0_i32_1 = arith.constant 0 : i32
    return %c0_i32, %c0_i32_0 : i32, i32
  }
  func.func @transform_3(%arg0: i32) -> (i32, i32, i32, i32) {
    %c0_i32 = arith.constant 0 : i32
    %c0_i32_0 = arith.constant 0 : i32
    %c0_i32_1 = arith.constant 0 : i32
    %c0_i32_2 = arith.constant 0 : i32
    return %arg0, %c0_i32, %c0_i32_0, %c0_i32_1 : i32, i32, i32, i32
  }
}

</mosaic_0001>

<bundles_post_ra>
// kernel: tpu_custom_call.1
= control target key start
LH: loop header
LB: loop body
LE: loop exit
PB: predicated region body
PF: predicated region fallthrough
CT: control target
= control target key end

     0   :  { %8 = vsyncpa [#allocation4], 0  ;;  %s8989_s0 = inlined_call_operand.vmem [shape: bf16[2,608,4], index: 0, kind: input, shape index: {}]   ;;  %s8990_s1 = inlined_call_operand.vmem [shape: bf16[3,3,4,128], index: 1, kind: input, shape index: {}]   ;;  %s8991_s2 = inlined_call_operand.vmem [shape: f32[1,128], index: 2, kind: input, shape index: {}]   ;;  %s8992_s3 = inlined_call_operand.hbm [shape: f32[2,16,16,128], index: 3, kind: output, shape index: {}]  }
   0x1   :  { %10 = vsyncpa [#allocation4 + $0x1], 0  ;;  %s7671_s12 = smov 0   ;;  %s7673_s13 = smov 0  }
   0x2   :  { %s7675_s14 = smov 0   ;;  %s7677_s15 = smov 0  }
   0x3 LB: > { %s7692_s16 = sadd.s32 4294967295, %s7646_s15   ;;  %s5731_s17 = sadd.s32 4294967294, %s7646_s15   ;;  %s7646_s15 = sphi %s7677_s15, %s9167_s15   ;;  %s7642_s14 = sphi %s7675_s14, %s9166_s14   ;;  %s7638_s13 = sphi %s7673_s13, %s9165_s13   ;;  %s7634_s12 = sphi %s7671_s12, %s9164_s12  }
   0x4   : > { %s7696_s18 = sadd.s32 1, %s7646_s15   ;;  %s91_s19 = sadd.s32 1, %s7642_s14 }
   0x5   : > { %s88_s20 = ssub.s32 %s7646_s15, %s7696_s18  ;;  %p101_p0 = scmp.ne.s32.totalorder %s7642_s14, %s7638_s13 }
   0x6   : > { %p89_p1 = scmp.eq.s32.totalorder %s88_s20, 0  ;;  %p102_p2 = scmp.eq.s32.totalorder %s7692_s16, 1 }
   0x7   : > { %p107_p3 = scmp.ne.s32.totalorder %s7638_s13, %s7634_s12  ;;  %p108_p4 = scmp.eq.s32.totalorder %s5731_s17, 1 }
   0x8   : > { %s7707_s21 = scalar_select %p89_p1, %s7642_s14, %s91_s19  }
   0x9   : > { %p7709_p5 = por %p102_p2, %p101_p0  ;;  %p7713_p6 = por %p108_p4, %p107_p3 }
   0xa   : > { %p5734_p7 = scmp.ge.s32.totalorder %s7646_s15, 1  ;;  %p140_p8 = scmp.lt.s32.totalorder %s7646_s15, 3 }
   0xc   : > { %p141_p9 = pnand %p5734_p7, %p140_p8 }
   0xe   : > { %144 = sbr.rel (%p141_p9) target bundleno = 840 (0x348), region = 32 }
  0x15   : > { %v379_v0 = vld [vmem:[%s8990_s1] sm:$0x3]  ;;  %vm637_vm0 = vcmask 1041408   ;;  %p164_p10 = scmp.lt.s32.totalorder %s7692_s16, 1  ;;  %v7728_v2 = vld [vmem:[%s8990_s1 + $0x8] sm:$0x3] }
  0x16   : > { %7485 = vmatprep.subr.msk.bf16.mxu1 %vm637_vm0, %v379_v0  ;;  %v639_v1 = vsel %vm637_vm0, %v379_v0, 0  ;;  %9062 = vst [vmem:[#allocation6_spill] sm:$0xff] %v7728_v2  ;;  %v5802_v3 = vld [vmem:[%s8990_s1 + $0x2] sm:$0x3]  ;;  %7489 = vmatprep.subr.msk.bf16.mxu0 %vm637_vm0, %v7728_v2  ;;  %v7738_v4 = vsel %vm637_vm0, %v7728_v2, 0  ;;  %vm540_vm1 = vcmask 31744  }
  0x17   : > { %6378 = vmatpush3.bf16.msra.mxu1 %v639_v1  ;;  %s165_s30 = scalar_select %p164_p10, %s7692_s16, 1  ;;  %9063 = vst [vmem:[#allocation7_spill] sm:$0xff] %v7738_v4  ;;  %6642 = vmatpush3.bf16.msra.mxu0 %v7738_v4  ;;  %v5939_v5 = vld [vmem:[%s8990_s1 + $0xa] sm:$0x3]  ;;  %v1453_v10 = vsel %vm637_vm0, %v5802_v3, 0  ;;  %vm1941_vm3 = vcmask 1046528  }
  0x18   : > { %7486 = vmatprep.subr.msk.bf16.mxu1 %vm637_vm0, %v5802_v3  ;;  %7491 = vmatprep.subr.msk.bf16.mxu0 %vm637_vm0, %v5939_v5  ;;  %vm1127_vm2 = vsmask.f32 7424  ;;  %v3622_v30 = vsel %vm637_vm0, %v5939_v5, 0  ;;  %v7814_v38 = vld [vmem:[%s8990_s1 + $0xc] sm:$0x3]  ;;  %s161_s4 = sand.u32 1, %s7638_s13  }
  0x19   : > { %s7495_s6 = smul.u32 304, %s165_s30  ;;  %s5735_s5 = sshll.u32 %s161_s4, 8 }
  0x1a   : > { %s6079_s7 = sshll.u32 %s7692_s16, 12  ;;  %s8948_s17 = scalar_lea.sflag [#allocation4], %s161_s4 }
  0x1b   : > { %s7749_s9 = scalar_lea.vmem %s8989_s0, %s7495_s6  ;;  %s8865_s6 = scalar_lea.vmem [#allocation3], %s5735_s5 }
  0x1c   : > { %v241_v6 = vld [vmem:[%s7749_s9] sm:$0xf]  ;;  %v7753_v7 = vld [vmem:[%s7749_s9 + $0x4] sm:$0xf]  ;;  %v7759_v9 = vld [vmem:[%s7749_s9 + $0x8] sm:$0xff]   ;;  %s5669_s8 = sshll.u32 %s8865_s6, 4  ;;  %s8940_s11 = scalar_lea.hbm %s8992_s3, %s6079_s7  ;;  %s8942_s8 = int_to_ptr.vmem [resolvable:$true] %s5669_s8 }
  0x1d   : > { %v7756_v8 = vcombine.low %v241_v6, %v7753_v7  ;;  %v7765_v11 = vld [vmem:[%s7749_s9 + $0x10] sm:$0xff]   ;;  %v7770_v12 = vld [vmem:[%s7749_s9 + $0x18] sm:$0xff]   ;;  %v7777_v15 = vld [vmem:[%s7749_s9 + $0x20] sm:$0xff]   ;;  %s7584_s16 = scalar_lea.vmem %s8942_s8, 4096  ;;  %s7648_s19 = smov [#allocation3]  }
  0x1e   : > { %v1141_v13 = vshll.u32 %v7765_v11, 16  ;;  %v1145_v14 = vshrl.u32 %v7765_v11, 16  ;;  %v1148_v16 = vshll.u32 %v7770_v12, 16  ;;  %v1152_v17 = vshrl.u32 %v7770_v12, 16  ;;  %v7782_v18 = vld [vmem:[%s7749_s9 + $0x28] sm:$0xff]   ;;  %v7785_v19 = vld [vmem:[%s7749_s9 + $0x30] sm:$0xff]   ;;  %p7585_p11 = scmp.ne.s32.totalorder %s8942_s8, %s7584_s16 }
  0x1f   : > { %6379 = vmatprep.mubr.msk.bf16.mxu1 %vm540_vm1, %v7756_v8  ;;  %v1155_v21 = vshll.u32 %v7777_v15, 16  ;;  %v1159_v22 = vshrl.u32 %v7777_v15, 16  ;;  %v7792_v23 = vld [vmem:[%s7749_s9 + $0x38] sm:$0xff]   ;;  %v1162_v25 = vshll.u32 %v7782_v18, 16  ;;  %v1169_v28 = vshll.u32 %v7785_v19, 16  ;;  %v7824_v41 = vld [vmem:[%s7749_s9 + $0x40] sm:$0xff]  }
  0x20   : > { %6380 = vmatmul.mubr.msk.bf16.vlgmr.msra.gmra.mrb[0].mxu1 %vm540_vm1, %v7759_v9  ;;  %v7787_v20 = vrot.slane %v1141_v13, 1  ;;  %v1150_v24 = vrot.slane %v1148_v16, 1  ;;  %v1166_v32 = vshrl.u32 %v7782_v18, 16  ;;  %v1173_v35 = vshrl.u32 %v7785_v19, 16  ;;  %v7829_v45 = vld [vmem:[%s7749_s9 + $0x48] sm:$0xff]   ;;  %v7850_v53 = vld [vmem:[%s7749_s9 + $0x50] sm:$0xff]   ;;  %p7586_p12 = pnand %p7585_p11, %p7709_p5 }
  0x21   : > { %6444 = vmatpush3.bf16.msra.mxu1 %v1453_v10  ;;  %6383 = vmatprep.mubr.msk.bf16.mxu1 %vm540_vm1, %v7765_v11  ;;  %v1157_v27 = vrot.slane %v1155_v21, 1  ;;  %v1164_v31 = vrot.slane %v1162_v25, 1  ;;  %v1176_v36 = vshll.u32 %v7792_v23, 16  ;;  %v1171_v40 = vrot.slane %v1169_v28, 1  ;;  %9064 = vst [vmem:[#allocation8_spill] sm:$0xff] %v7829_v45  ;;  %v7855_v57 = vld [vmem:[%s7749_s9 + $0x58] sm:$0xff]  }
  0x22   : > { %v1147_v26 = vor.u32 %v1145_v14, %v7787_v20  ;;  %v1154_v29 = vor.u32 %v1152_v17, %v1150_v24  ;;  %v1183_v46 = vshll.u32 %v7824_v41, 16  ;;  %v1180_v48 = vshrl.u32 %v7792_v23, 16  ;;  %9065 = vst [vmem:[#allocation9_spill] sm:$0xff] %v7855_v57  ;;  %v7874_v1 = vld [vmem:[%s7749_s9 + $0x60] sm:$0xff]   ;;  %v7879_v10 = vld [vmem:[%s7749_s9 + $0x68] sm:$0xff]   ;;  %v7898_v25 = vld [vmem:[%s7749_s9 + $0x70] sm:$0xff]   ;;  %p7587_p13 = pneg %p7586_p12 }
  0x23   : > { %v1161_v34 = vor.u32 %v1159_v22, %v1157_v27  ;;  %v1168_v42 = vor.u32 %v1166_v32, %v1164_v31  ;;  %v1175_v43 = vor.u32 %v1173_v35, %v1171_v40  ;;  %v1178_v44 = vrot.slane %v1176_v36, 1  ;;  %9068 = vst [vmem:[#allocation12_spill] sm:$0xff] %v7874_v1  ;;  %9069 = vst [vmem:[#allocation13_spill] sm:$0xff] %v7879_v10  ;;  %s7588_s20 = sshll.u32 %s7648_s19, 4  ;;  %s7589_s20 = int_to_ptr.vmem [resolvable:$false] %s7588_s20 }
  0x24   : > { %v7800_v33 = vsel %vm1127_vm2, %v1147_v26, %v1150_v24  ;;  %v7807_v37 = vsel %vm1127_vm2, %v1154_v29, %v1157_v27  ;;  %v1187_v50 = vshrl.u32 %v7824_v41, 16  ;;  %v1190_v51 = vshll.u32 %v7829_v45, 16  ;;  %v7903_v29 = vld [vmem:[%s7749_s9 + $0x78] sm:$0xff]   ;;  %s7590_s24 = scalar_lea.vmem %s7589_s20, 8192  ;;  %p7591_p0 = scmp.lt.s32.totalorder %s8942_s8, %s7589_s20 }
  0x25   : > { %6643 = vmatprep.mubr.msk.bf16.mxu0 %vm540_vm1, %v7800_v33  ;;  %v7819_v39 = vsel %vm1127_vm2, %v1161_v34, %v1164_v31  ;;  %v7835_v47 = vsel %vm1127_vm2, %v1168_v42, %v1171_v40  ;;  %v7839_v49 = vsel %vm1127_vm2, %v1175_v43, %v1178_v44  ;;  %v1185_v52 = vrot.slane %v1183_v46, 1  ;;  %v7929_v43 = vld [vmem:[%s7749_s9 + $0x80] sm:$0xff]   ;;  %p7592_p1 = scmp.lt.s32.totalorder %s7590_s24, %s7584_s16 }
  0x26   : > { %6644 = vmatmul.mubr.msk.bf16.vlgmr.msra.gmra.mrb[0].mxu0 %vm540_vm1, %v7807_v37  ;;  %v1182_v54 = vor.u32 %v1180_v48, %v1178_v44  ;;  %v1192_v56 = vrot.slane %v1190_v51, 1  ;;  %v1197_v58 = vshll.u32 %v7850_v53, 16  ;;  %v1194_v60 = vshrl.u32 %v7829_v45, 16 }
  0x27   : > { %6708 = vmatpush3.bf16.msra.mxu0 %v3622_v30  ;;  %6647 = vmatprep.mubr.msk.bf16.mxu0 %vm540_vm1, %v7819_v39  ;;  %v1189_v55 = vor.u32 %v1187_v50, %v1185_v52  ;;  %v1201_v62 = vshrl.u32 %v7850_v53, 16  ;;  %v1204_v63 = vshll.u32 %v7855_v57, 16  ;;  %v1211_v13 = vshll.u32 %v7874_v1, 16  ;;  %v7908_v30 = vld [vmem:[%s8990_s1 + $0x4] sm:$0x3]  ;;  %v7934_v50 = vld [vmem:[%s7749_s9 + $0x88] sm:$0xff]   ;;  %p7593_p2 = por %p7592_p1, %p7591_p0 }
  0x28   : > { %6384 = vmatmul.mubr.msk.bf16.gmra.mrb[4].mxu1 %vm540_vm1, %v7770_v12  ;;  %7492 = vmatprep.subr.msk.bf16.mxu0 %vm637_vm0, %v7814_v38  ;;  %v7859_v59 = vsel %vm1127_vm2, %v1182_v54, %v1185_v52  ;;  %v1199_v0 = vrot.slane %v1197_v58, 1  ;;  %v1196_v3 = vor.u32 %v1194_v60, %v1192_v56  ;;  %v1208_v16 = vshrl.u32 %v7855_v57, 16 }
  0x29   : > { %6387 = vmatprep.mubr.msk.bf16.mxu1 %vm540_vm1, %v7777_v15  ;;  %9066 = vst [vmem:[#allocation10_spill] sm:$0xff] %v7859_v59  ;;  %v7863_v61 = vsel %vm1127_vm2, %v1189_v55, %v1192_v56  ;;  %v1206_v6 = vrot.slane %v1204_v63, 1  ;;  %v1215_v21 = vshrl.u32 %v7874_v1, 16  ;;  %v1218_v22 = vshll.u32 %v7879_v10, 16  ;;  %7487 = vmatprep.subr.msk.bf16.mxu1 %vm637_vm0, %v7908_v30  ;;  %v7955_v63 = vld [vmem:[%s7749_s9 + $0x90] sm:$0xff]   ;;  %p7594_p3 = pnand %p7593_p2, %p7587_p13 }
  0x2a   : > { %9067 = vst [vmem:[#allocation11_spill] sm:$0xff] %v7863_v61  ;;  %v1203_v5 = vor.u32 %v1201_v62, %v1199_v0  ;;  %v7883_v14 = vsel %vm1127_vm2, %v1196_v3, %v1199_v0  ;;  %v1213_v24 = vrot.slane %v1211_v13, 1  ;;  %v1225_v31 = vshll.u32 %v7898_v25, 16 }
  0x2b   : > { %9070 = vst [vmem:[#allocation14_spill] sm:$0xff] %v7883_v14  ;;  %v1210_v26 = vor.u32 %v1208_v16, %v1206_v6  ;;  %v1220_v28 = vrot.slane %v1218_v22, 1  ;;  %v1222_v34 = vshrl.u32 %v7879_v10, 16  ;;  %v1229_v36 = vshrl.u32 %v7898_v25, 16 }
  0x2c   : > { %v7887_v17 = vsel %vm1127_vm2, %v1203_v5, %v1206_v6  ;;  %v1217_v27 = vor.u32 %v1215_v21, %v1213_v24  ;;  %v1232_v40 = vshll.u32 %v7903_v29, 16  ;;  %v1227_v42 = vrot.slane %v1225_v31, 1 }
  0x2d   : > { %9071 = vst [vmem:[#allocation15_spill] sm:$0xff] %v7887_v17  ;;  %v7914_v32 = vsel %vm1127_vm2, %v1210_v26, %v1213_v24  ;;  %v1224_v44 = vor.u32 %v1222_v34, %v1220_v28  ;;  %v1239_v51 = vshll.u32 %v7929_v43, 16  ;;  %v1236_v54 = vshrl.u32 %v7903_v29, 16  ;;  %v7997_v34 = vld [vmem:[%s7749_s9 + $0x98] sm:$0xff]  }
  0x2e   : > { %6648 = vmatmul.mubr.msk.bf16.gmra.mrb[4].mxu0 %vm540_vm1, %v7835_v47  ;;  %9072 = vst [vmem:[#allocation16_spill] sm:$0xff] %v7914_v32  ;;  %v7918_v35 = vsel %vm1127_vm2, %v1217_v27, %v1220_v28  ;;  %v1231_v46 = vor.u32 %v1229_v36, %v1227_v42  ;;  %v1234_v48 = vrot.slane %v1232_v40, 1  ;;  %v1243_v56 = vshrl.u32 %v7929_v43, 16  ;;  %v8000_v36 = vld [vmem:[%s7749_s9 + $0xa0] sm:$0xff]  }
  0x2f   : > { %6651 = vmatprep.mubr.msk.bf16.mxu0 %vm540_vm1, %v7839_v49  ;;  %9073 = vst [vmem:[#allocation17_spill] sm:$0xff] %v7918_v35  ;;  %v7938_v52 = vsel %vm1127_vm2, %v1224_v44, %v1227_v42  ;;  %v1246_v58 = vshll.u32 %v7934_v50, 16  ;;  %v1241_v60 = vrot.slane %v1239_v51, 1  ;;  %v1250_v6 = vshrl.u32 %v7934_v50, 16  ;;  %v8028_v51 = vld [vmem:[%s7749_s9 + $0xa8] sm:$0xff]  }
  0x30   : > { %6388 = vmatmul.mubr.msk.bf16.gmra.mrb[8].mxu1 %vm540_vm1, %v7782_v18  ;;  %9074 = vst [vmem:[#allocation18_spill] sm:$0xff] %v7938_v52  ;;  %v7942_v55 = vsel %vm1127_vm2, %v1231_v46, %v1234_v48  ;;  %v1238_v62 = vor.u32 %v1236_v54, %v1234_v48  ;;  %v1253_v13 = vshll.u32 %v7955_v63, 16  ;;  %v8993_v24 = vrot.slane %v7765_v11, 1  ;;  %v8015_v46 = vld [vmem:[%s8990_s1 + $0xe] sm:$0x3]  ;;  %v8031_v54 = vld [vmem:[%s7749_s9 + $0xb0] sm:$0xff]  }
  0x31   : > { %6391 = vmatprep.mubr.msk.bf16.mxu1 %vm540_vm1, %v7785_v19  ;;  %9075 = vst [vmem:[#allocation19_spill] sm:$0xff] %v7942_v55  ;;  %v1245_v0 = vor.u32 %v1243_v56, %v1241_v60  ;;  %v1248_v3 = vrot.slane %v1246_v58, 1  ;;  %v1947_v26 = vrot.slane %v7770_v12, 1  ;;  %v1949_v12 = vrot.slane %v7777_v15, 1 }
  0x32   : > { %v7958_v5 = vsel %vm1127_vm2, %v1238_v62, %v1241_v60  ;;  %v7973_v22 = vrot.slane %v1253_v13, 1  ;;  %v1951_v31 = vrot.slane %v7782_v18, 1  ;;  %v4122_v42 = vsel %vm637_vm0, %v7814_v38, 0 }
  0x33   : > { %9076 = vst [vmem:[#allocation20_spill] sm:$0xff] %v7958_v5  ;;  %v7963_v16 = vsel %vm1127_vm2, %v1245_v0, %v1248_v3  ;;  %v1252_v21 = vor.u32 %v1250_v6, %v1248_v3  ;;  %v7984_v28 = vsel %vm1941_vm3, %v8993_v24, %v1947_v26  ;;  %v8003_v40 = vsel %vm1941_vm3, %v1947_v26, %v1949_v12  ;;  %v8050_v0 = vld [vmem:[%s7749_s9 + $0xb8] sm:$0xff]   ;;  %v8053_v3 = vld [vmem:[%s7749_s9 + $0xc0] sm:$0xff]  }
  0x34   : > { %9077 = vst [vmem:[#allocation21_spill] sm:$0xff] %v7963_v16  ;;  %9078 = vst [vmem:[#allocation22_spill] sm:$0xff] %v7984_v28  ;;  %v8008_v44 = vsel %vm1941_vm3, %v1949_v12, %v1951_v31  ;;  %v1953_v38 = vrot.slane %v7785_v19, 1  ;;  %v1955_v48 = vrot.slane %v7792_v23, 1  ;;  %v1957_v60 = vrot.slane %v7824_v41, 1  ;;  %v8072_v12 = vld [vmem:[%s7749_s9 + $0xc8] sm:$0xff]  }
  0x35   : > { %v7979_v27 = vsel %vm1127_vm2, %v1252_v21, %v7973_v22  ;;  %9079 = vst [vmem:[#allocation23_spill] sm:$0xff] %v8003_v40  ;;  %9080 = vst [vmem:[#allocation24_spill] sm:$0xff] %v8008_v44  ;;  %v1959_v62 = vrot.slane %v7829_v45, 1  ;;  %v1961_v21 = vrot.slane %v7850_v53, 1  ;;  %v1963_v26 = vrot.slane %v7855_v57, 1 }
  0x36   : > { %6652 = vmatmul.mubr.msk.bf16.gmra.mrb[8].mxu0 %vm540_vm1, %v7859_v59  ;;  %v8034_v56 = vsel %vm1941_vm3, %v1951_v31, %v1953_v38  ;;  %v8037_v58 = vsel %vm1941_vm3, %v1953_v38, %v1955_v48  ;;  %v8056_v6 = vsel %vm1941_vm3, %v1955_v48, %v1957_v60  ;;  %v8075_v31 = vld [vmem:[%s7749_s9 + $0xd0] sm:$0xff]   ;;  %v1965_v48 = vrot.slane %v7874_v1, 1 }
  0x37   : > { %6655 = vmatprep.mubr.msk.bf16.mxu0 %vm540_vm1, %v7863_v61  ;;  %9081 = vst [vmem:[#allocation25_spill] sm:$0xff] %v8034_v56  ;;  %9082 = vst [vmem:[#allocation26_spill] sm:$0xff] %v8037_v58  ;;  %v8059_v13 = vsel %vm1941_vm3, %v1957_v60, %v1959_v62  ;;  %v8081_v38 = vsel %vm1941_vm3, %v1961_v21, %v1963_v26  ;;  %v1967_v60 = vrot.slane %v7879_v10, 1 }
  0x38   : > { %6392 = vmatmul.mubr.msk.bf16.gmra.mrb[12].mxu1 %vm540_vm1, %v7792_v23  ;;  %9083 = vst [vmem:[#allocation27_spill] sm:$0xff] %v8056_v6  ;;  %9084 = vst [vmem:[#allocation28_spill] sm:$0xff] %v8059_v13  ;;  %v8100_v24 = vsel %vm1941_vm3, %v1963_v26, %v1965_v48  ;;  %v1969_v26 = vrot.slane %v7898_v25, 1 }
  0x39   : > { %6395 = vmatprep.mubr.msk.bf16.mxu1 %vm540_vm1, %v7824_v41  ;;  %9086 = vst [vmem:[#allocation30_spill] sm:$0xff] %v8081_v38  ;;  %9087 = vst [vmem:[#allocation31_spill] sm:$0xff] %v8100_v24  ;;  %v8103_v4 = vsel %vm1941_vm3, %v1965_v48, %v1967_v60  ;;  %v8117_v48 = vld [vmem:[%s7749_s9 + $0xe8] sm:$0xff]  }
  0x3a   : > { %9088 = vst [vmem:[#allocation32_spill] sm:$0xff] %v8103_v4 }
  0x3e   : > { %6656 = vmatmul.mubr.msk.bf16.gmra.mrb[12].mxu0 %vm540_vm1, %v7883_v14 }
  0x3f   : > { %6659 = vmatprep.mubr.msk.bf16.mxu0 %vm540_vm1, %v7887_v17 }
  0x40   : > { %6396 = vmatmul.mubr.msk.bf16.gmra.mrb[16].mxu1 %vm540_vm1, %v7829_v45 }
  0x41   : > { %6399 = vmatprep.mubr.msk.bf16.mxu1 %vm540_vm1, %v7850_v53 }
  0x46   : > { %6660 = vmatmul.mubr.msk.bf16.gmra.mrb[16].mxu0 %vm540_vm1, %v7914_v32 }
  0x47   : > { %6663 = vmatprep.mubr.msk.bf16.mxu0 %vm540_vm1, %v7918_v35 }
  0x48   : > { %6400 = vmatmul.mubr.msk.bf16.gmra.mrb[20].mxu1 %vm540_vm1, %v7855_v57 }
  0x49   : > { %6403 = vmatprep.mubr.msk.bf16.mxu1 %vm540_vm1, %v7874_v1 }
  0x4e   : > { %6664 = vmatmul.mubr.msk.bf16.gmra.mrb[20].mxu0 %vm540_vm1, %v7938_v52 }
  0x4f   : > { %6667 = vmatprep.mubr.msk.bf16.mxu0 %vm540_vm1, %v7942_v55 }
  0x50   : > { %6404 = vmatmul.mubr.msk.bf16.gmra.mrb[24].mxu1 %vm540_vm1, %v7879_v10 }
  0x51   : > { %6407 = vmatprep.mubr.msk.bf16.mxu1 %vm540_vm1, %v7898_v25 }
  0x56   : > { %6668 = vmatmul.mubr.msk.bf16.gmra.mrb[24].mxu0 %vm540_vm1, %v7958_v5 }
  0x57   : > { %6671 = vmatprep.mubr.msk.bf16.mxu0 %vm540_vm1, %v7963_v16 }
  0x58   : > { %6408 = vmatmul.mubr.msk.bf16.gmra.mrb[28].mxu1 %vm540_vm1, %v7903_v29 }
  0x59   : > { %6411 = vmatprep.mubr.msk.bf16.mxu1 %vm540_vm1, %v7929_v43 }
  0x5e   : > { %6672 = vmatmul.mubr.msk.bf16.gmra.mrb[28].mxu0 %vm540_vm1, %v7979_v27 }
  0x5f   : > { %6709 = vmatprep.mubr.msk.bf16.mxu0 %vm540_vm1, %v7984_v28 }
  0x60   : > { %6412 = vmatmul.mubr.msk.bf16.gmra.mrb[32].mxu1 %vm540_vm1, %v7934_v50 }
  0x61   : > { %6415 = vmatprep.mubr.msk.bf16.mxu1 %vm540_vm1, %v7955_v63 }
  0x66   : > { %6710 = vmatmul.mubr.msk.bf16.vlgmr.msra.gmra.mrb[0].mxu0 %vm540_vm1, %v8003_v40  ;;  %v1138_v40 = vshrl.u32 %v7759_v9, 16 }
  0x67   : > { %6774 = vmatpush3.bf16.msra.mxu0 %v4122_v42  ;;  %6713 = vmatprep.mubr.msk.bf16.mxu0 %vm540_vm1, %v8008_v44  ;;  %v8078_v42 = vsel %vm1941_vm3, %v1959_v62, %v1961_v21  ;;  %v8094_v62 = vld [vmem:[%s7749_s9 + $0xd8] sm:$0xff]   ;;  %v8097_v21 = vld [vmem:[%s7749_s9 + $0xe0] sm:$0xff]  }
  0x68   : > { %6416 = vmatmul.mubr.msk.bf16.gmra.mrb[36].mxu1 %vm540_vm1, %v7997_v34  ;;  %7493 = vmatprep.subr.msk.bf16.mxu0 %vm637_vm0, %v8015_v46  ;;  %9085 = vst [vmem:[#allocation29_spill] sm:$0xff] %v8078_v42 }
  0x69   : > { %6419 = vmatprep.mubr.msk.bf16.mxu1 %vm540_vm1, %v8000_v36 }
  0x6e   : > { %6714 = vmatmul.mubr.msk.bf16.gmra.mrb[4].mxu0 %vm540_vm1, %v8034_v56  ;;  %v1134_v56 = vshll.u32 %v7759_v9, 16 }
  0x6f   : > { %6717 = vmatprep.mubr.msk.bf16.mxu0 %vm540_vm1, %v8037_v58  ;;  %v8124_v58 = vsel %vm1941_vm3, %v1967_v60, %v1969_v26 }
  0x70   : > { %6420 = vmatmul.mubr.msk.bf16.gmra.mrb[40].mxu1 %vm540_vm1, %v8028_v51  ;;  %9089 = vst [vmem:[#allocation33_spill] sm:$0xff] %v8124_v58  ;;  %v1136_v60 = vrot.slane %v1134_v56, 1  ;;  %v1977_v56 = vrot.slane %v7955_v63, 1 }
  0x71   : > { %6423 = vmatprep.mubr.msk.bf16.mxu1 %vm540_vm1, %v8031_v54 }
  0x76   : > { %6718 = vmatmul.mubr.msk.bf16.gmra.mrb[8].mxu0 %vm540_vm1, %v8056_v6  ;;  %v1128_v6 = vshrl.u32 %v7756_v8, 16 }
  0x77   : > { %6721 = vmatprep.mubr.msk.bf16.mxu0 %vm540_vm1, %v8059_v13  ;;  %v8120_v13 = vld [vmem:[%s7749_s9 + $0xf0] sm:$0xff]  }
  0x78   : > { %6424 = vmatmul.mubr.msk.bf16.gmra.mrb[44].mxu1 %vm540_vm1, %v8050_v0 }
  0x79   : > { %6427 = vmatprep.mubr.msk.bf16.mxu1 %vm540_vm1, %v8053_v3 }
  0x7e   : > { %6722 = vmatmul.mubr.msk.bf16.gmra.mrb[12].mxu0 %vm540_vm1, %v8078_v42  ;;  %v1971_v42 = vrot.slane %v7903_v29, 1 }
  0x7f   : > { %6725 = vmatprep.mubr.msk.bf16.mxu0 %vm540_vm1, %v8081_v38  ;;  %v1130_v38 = vshll.u32 %v7756_v8, 16  ;;  %v1973_v8 = vrot.slane %v7929_v43, 1 }
  0x80   : > { %6428 = vmatmul.mubr.msk.bf16.gmra.mrb[48].mxu1 %vm540_vm1, %v8072_v12  ;;  %v8128_v44 = vsel %vm1941_vm3, %v1969_v26, %v1971_v42  ;;  %v8141_v26 = vld [vmem:[%s7749_s9 + $0xf8] sm:$0xff]  }
  0x81   : > { %6431 = vmatprep.mubr.msk.bf16.mxu1 %vm540_vm1, %v8075_v31  ;;  %v8145_v2 = vsel %vm1941_vm3, %v1971_v42, %v1973_v8 }
  0x86   : > { %6726 = vmatmul.mubr.msk.bf16.gmra.mrb[16].mxu0 %vm540_vm1, %v8100_v24  ;;  %v1132_v24 = vrot.slane %v1130_v38, 1 }
  0x87   : > { %6729 = vmatprep.mubr.msk.bf16.mxu0 %vm540_vm1, %v8103_v4  ;;  %v1975_v4 = vrot.slane %v7934_v50, 1 }
  0x88   : > { %6432 = vmatmul.mubr.msk.bf16.gmra.mrb[52].mxu1 %vm540_vm1, %v8094_v62  ;;  %v1133_v38 = vor.u32 %v1132_v24, %v1128_v6  ;;  %v1140_v24 = vor.u32 %v1138_v40, %v1136_v60  ;;  %v1979_v6 = vrot.slane %v7997_v34, 1 }
  0x89   : > { %6435 = vmatprep.mubr.msk.bf16.mxu1 %vm540_vm1, %v8097_v21  ;;  %v8149_v28 = vsel %vm1941_vm3, %v1973_v8, %v1975_v4  ;;  %v8163_v8 = vsel %vm1941_vm3, %v1975_v4, %v1977_v56  ;;  %v1981_v4 = vrot.slane %v8000_v36, 1 }
  0x8a   : > { %v1144_v42 = vsel %vm1127_vm2, %v1140_v24, %v7787_v20  ;;  %v8168_v40 = vsel %vm1941_vm3, %v1977_v56, %v1979_v6  ;;  %v1983_v20 = vrot.slane %v8028_v51, 1  ;;  %v1987_v24 = vrot.slane %v8050_v0, 1 }
  0x8e   : > { %6730 = vmatmul.mubr.msk.bf16.gmra.mrb[20].mxu0 %vm540_vm1, %v8124_v58  ;;  %v1137_v58 = vsel %vm1127_vm2, %v1133_v38, %v1136_v60  ;;  %v2104_v38 = vsel %vm637_vm0, %v7908_v30, 0  ;;  %v8187_v30 = vsel %vm1941_vm3, %v1979_v6, %v1981_v4  ;;  %v8190_v60 = vsel %vm1941_vm3, %v1981_v4, %v1983_v20 }
  0x8f   : > { %6733 = vmatprep.mubr.msk.bf16.mxu0 %vm540_vm1, %v8128_v44 }
  0x90   : > { %6436 = vmatmul.mubr.msk.bf16.gmra.mrb[56].mxu1 %vm540_vm1, %v8117_v48 }
  0x91   : > { %6439 = vmatprep.mubr.msk.bf16.mxu1 %vm540_vm1, %v8120_v13 }
  0x96   : > { %6734 = vmatmul.mubr.msk.bf16.gmra.mrb[24].mxu0 %vm540_vm1, %v8145_v2 }
  0x97   : > { %6737 = vmatprep.mubr.msk.bf16.mxu0 %vm540_vm1, %v8149_v28 }
  0x98   : > { %6440 = vmatmul.mubr.msk.bf16.gmra.mrb[60].mxu1 %vm540_vm1, %v8141_v26 }
  0x99   : > { %6445 = vmatprep.mubr.msk.bf16.mxu1 %vm540_vm1, %v1137_v58  ;;  %v8176_v58 = vld [vmem:[%s8990_s1 + $0x6] sm:$0x3] }
  0x9e   : > { %6738 = vmatmul.mubr.msk.bf16.gmra.mrb[28].mxu0 %vm540_vm1, %v8163_v8 }
  0x9f   : > { %6741 = vmatprep.mubr.msk.bf16.mxu0 %vm540_vm1, %v8168_v40 }
  0xa0   : > { %6446 = vmatmul.mubr.msk.bf16.vlgmr.msra.gmra.mrb[0].mxu1 %vm540_vm1, %v1144_v42  ;;  %v1991_v42 = vrot.slane %v8072_v12, 1 }
  0xa1   : > { %6510 = vmatpush3.bf16.msra.mxu1 %v2104_v38  ;;  %6449 = vmatprep.mubr.msk.bf16.mxu1 %vm540_vm1, %v7800_v33  ;;  %v1985_v33 = vrot.slane %v8031_v54, 1 }
  0xa2   : > { %7488 = vmatprep.subr.msk.bf16.mxu1 %vm637_vm0, %v8176_v58 }
  0xa3   : > { %v8203_v56 = vsel %vm1941_vm3, %v1983_v20, %v1985_v33  ;;  %v8206_v6 = vsel %vm1941_vm3, %v1985_v33, %v1987_v24  ;;  %v1993_v20 = vrot.slane %v8075_v31, 1  ;;  %v1995_v33 = vrot.slane %v8094_v62, 1 }
  0xa4   : > { %9090 = vst [vmem:[#allocation34_spill] sm:$0xff] %v8206_v6 }
  0xa6   : > { %6742 = vmatmul.mubr.msk.bf16.gmra.mrb[32].mxu0 %vm540_vm1, %v8187_v30 }
  0xa7   : > { %6745 = vmatprep.mubr.msk.bf16.mxu0 %vm540_vm1, %v8190_v60 }
  0xa8   : > { %6450 = vmatmul.mubr.msk.bf16.gmra.mrb[4].mxu1 %vm540_vm1, %v7807_v37  ;;  %v1989_v37 = vrot.slane %v8053_v3, 1 }
  0xa9   : > { %6453 = vmatprep.mubr.msk.bf16.mxu1 %vm540_vm1, %v7819_v39 }
  0xaa   : > { %v8219_v38 = vsel %vm1941_vm3, %v1987_v24, %v1989_v37  ;;  %v8222_v4 = vsel %vm1941_vm3, %v1989_v37, %v1991_v42  ;;  %v8235_v24 = vsel %vm1941_vm3, %v1991_v42, %v1993_v20  ;;  %v8238_v37 = vsel %vm1941_vm3, %v1993_v20, %v1995_v33 }
  0xab   : > { %9091 = vst [vmem:[#allocation35_spill] sm:$0xff] %v8219_v38  ;;  %9092 = vst [vmem:[#allocation36_spill] sm:$0xff] %v8222_v4  ;;  %v1997_v42 = vrot.slane %v8097_v21, 1 }
  0xac   : > { %9093 = vst [vmem:[#allocation37_spill] sm:$0xff] %v8235_v24  ;;  %9094 = vst [vmem:[#allocation38_spill] sm:$0xff] %v8238_v37 }
  0xad   : > { %v8251_v20 = vsel %vm1941_vm3, %v1995_v33, %v1997_v42  ;;  %v8266_v33 = vrot.slane %v8141_v26, 1 }
  0xae   : > { %6746 = vmatmul.mubr.msk.bf16.gmra.mrb[36].mxu0 %vm540_vm1, %v8203_v56  ;;  %9095 = vst [vmem:[#allocation39_spill] sm:$0xff] %v8251_v20 }
  0xaf   : > { %6749 = vmatprep.mubr.msk.bf16.mxu0 %vm540_vm1, %v8206_v6  ;;  %9097 = vst [vmem:[#allocation41_spill] sm:$0xff] %v8266_v33  ;;  %v1264_v6 = vshrl.u32 %v7997_v34, 16 }
  0xb0   : > { %6454 = vmatmul.mubr.msk.bf16.gmra.mrb[8].mxu1 %vm540_vm1, %v7835_v47 }
  0xb1   : > { %6457 = vmatprep.mubr.msk.bf16.mxu1 %vm540_vm1, %v7839_v49 }
  0xb6   : > { %6750 = vmatmul.mubr.msk.bf16.gmra.mrb[40].mxu0 %vm540_vm1, %v8219_v38 }
  0xb7   : > { %6753 = vmatprep.mubr.msk.bf16.mxu0 %vm540_vm1, %v8222_v4  ;;  %v1999_v4 = vrot.slane %v8117_v48, 1 }
  0xb8   : > { %6458 = vmatmul.mubr.msk.bf16.gmra.mrb[12].mxu1 %vm540_vm1, %v7859_v59  ;;  %v1274_v59 = vshll.u32 %v8028_v51, 16 }
  0xb9   : > { %6461 = vmatprep.mubr.msk.bf16.mxu1 %vm540_vm1, %v7863_v61  ;;  %v8254_v38 = vsel %vm1941_vm3, %v1997_v42, %v1999_v4  ;;  %v8269_v42 = vld [vmem:[%s7749_s9 + $0x100] sm:$0xf] }
  0xba   : > { %9096 = vst [vmem:[#allocation40_spill] sm:$0xff] %v8254_v38 }
  0xbe   : > { %6754 = vmatmul.mubr.msk.bf16.gmra.mrb[44].mxu0 %vm540_vm1, %v8235_v24  ;;  %v306_v24 = vld [vmem:[%s7749_s9 + $0x104] sm:$0xf] }
  0xbf   : > { %6757 = vmatprep.mubr.msk.bf16.mxu0 %vm540_vm1, %v8238_v37  ;;  %v2001_v37 = vrot.slane %v8120_v13, 1 }
  0xc0   : > { %6462 = vmatmul.mubr.msk.bf16.gmra.mrb[16].mxu1 %vm540_vm1, %v7883_v14 }
  0xc1   : > { %6465 = vmatprep.mubr.msk.bf16.mxu1 %vm540_vm1, %v7887_v17  ;;  %v8283_v17 = vld [vmem:[%s7749_s9 + $0x108] sm:$0xff]  }
  0xc6   : > { %6758 = vmatmul.mubr.msk.bf16.gmra.mrb[48].mxu0 %vm540_vm1, %v8251_v20  ;;  %v8276_v20 = vcombine.low %v8269_v42, %v306_v24  ;;  %v8295_v24 = vrot.slane %v8283_v17, 1 }
  0xc7   : > { %6761 = vmatprep.mubr.msk.bf16.mxu0 %vm540_vm1, %v8254_v38 }
  0xc8   : > { %6466 = vmatmul.mubr.msk.bf16.gmra.mrb[20].mxu1 %vm540_vm1, %v7914_v32  ;;  %v8273_v32 = vsel %vm1941_vm3, %v1999_v4, %v2001_v37  ;;  %v3606_v4 = vrot.slane %v8276_v20, 1  ;;  %9100 = vst [vmem:[#allocation44_spill] sm:$0xff] %v8295_v24 }
  0xc9   : > { %6469 = vmatprep.mubr.msk.bf16.mxu1 %vm540_vm1, %v7918_v35  ;;  %9098 = vst [vmem:[#allocation42_spill] sm:$0xff] %v8273_v32  ;;  %v8280_v35 = vsel %vm1941_vm3, %v2001_v37, %v8266_v33  ;;  %v8298_v37 = vld [vmem:[%s7749_s9 + $0x110] sm:$0xf] }
  0xca   : > { %9099 = vst [vmem:[#allocation43_spill] sm:$0xff] %v8280_v35  ;;  %v8302_v38 = vsel %vm1941_vm3, %v8266_v33, %v3606_v4 }
  0xcb   : > { %9101 = vst [vmem:[#allocation45_spill] sm:$0xff] %v8302_v38 }
  0xce   : > { %6762 = vmatmul.mubr.msk.bf16.gmra.mrb[52].mxu0 %vm540_vm1, %v8273_v32  ;;  %v8306_v32 = vcombine.low %v8298_v37, %v8298_v37 }
  0xcf   : > { %6765 = vmatprep.mubr.msk.bf16.mxu0 %vm540_vm1, %v8280_v35  ;;  %v8312_v35 = vsel %vm1941_vm3, %v3606_v4, %v8295_v24  ;;  %v1267_v4 = vshll.u32 %v8000_v36, 16 }
  0xd0   : > { %6470 = vmatmul.mubr.msk.bf16.gmra.mrb[24].mxu1 %vm540_vm1, %v7938_v52  ;;  %9102 = vst [vmem:[#allocation46_spill] sm:$0xff] %v8306_v32  ;;  %v1260_v52 = vshll.u32 %v7997_v34, 16  ;;  %9103 = vst [vmem:[#allocation47_spill] sm:$0xff] %v8312_v35  ;;  %v3610_v33 = vrot.slane %v8306_v32, 1  ;;  %v1288_v32 = vshll.u32 %v8050_v0, 16 }
  0xd1   : > { %6473 = vmatprep.mubr.msk.bf16.mxu1 %vm540_vm1, %v7942_v55  ;;  %v1257_v55 = vshrl.u32 %v7955_v63, 16 }
  0xd2   : > { %v1262_v61 = vrot.slane %v1260_v52, 1 }
  0xd3   : > { %v1259_v14 = vor.u32 %v1257_v55, %v7973_v22  ;;  %v1281_v22 = vshll.u32 %v8031_v54, 16 }
  0xd4   : > { %v1266_v52 = vor.u32 %v1264_v6, %v1262_v61  ;;  %v1295_v6 = vshll.u32 %v8053_v3, 16 }
  0xd6   : > { %6766 = vmatmul.mubr.msk.bf16.gmra.mrb[56].mxu0 %vm540_vm1, %v8302_v38  ;;  %v8329_v38 = vsel %vm1127_vm2, %v1259_v14, %v1262_v61  ;;  %v1276_v14 = vrot.slane %v1274_v59, 1  ;;  %v4639_v61 = vsel %vm637_vm0, %v8015_v46, 0  ;;  %v8357_v59 = vld [vmem:[%s8990_s1 + $0x10] sm:$0x3]  ;;  %v1290_v46 = vrot.slane %v1288_v32, 1 }
  0xd7   : > { %6769 = vmatprep.mubr.msk.bf16.mxu0 %vm540_vm1, %v8312_v35  ;;  %v1269_v35 = vrot.slane %v1267_v4, 1 }
  0xd8   : > { %6474 = vmatmul.mubr.msk.bf16.gmra.mrb[28].mxu1 %vm540_vm1, %v7958_v5  ;;  %v3611_v5 = vsel %vm1941_vm3, %v8295_v24, %v3610_v33  ;;  %v1278_v24 = vshrl.u32 %v8028_v51, 16 }
  0xd9   : > { %6477 = vmatprep.mubr.msk.bf16.mxu1 %vm540_vm1, %v7963_v16  ;;  %v1271_v16 = vshrl.u32 %v8000_v36, 16  ;;  %v8342_v33 = vsel %vm1127_vm2, %v1266_v52, %v1269_v35 }
  0xdb   : > { %v1273_v55 = vor.u32 %v1271_v16, %v1269_v35  ;;  %v1280_v35 = vor.u32 %v1278_v24, %v1276_v14  ;;  %v1299_v24 = vshrl.u32 %v8053_v3, 16 }
  0xdd   : > { %v8346_v4 = vsel %vm1127_vm2, %v1273_v55, %v1276_v14  ;;  %v1302_v14 = vshll.u32 %v8072_v12, 16 }
  0xde   : > { %6770 = vmatmul.mubr.msk.bf16.gmra.mrb[60].mxu0 %vm540_vm1, %v3611_v5  ;;  %v1285_v5 = vshrl.u32 %v8031_v54, 16 }
  0xdf   : > { %6775 = vmatprep.mubr.msk.bf16.mxu0 %vm540_vm1, %v7777_v15  ;;  %v1283_v15 = vrot.slane %v1281_v22, 1 }
  0xe0   : > { %6478 = vmatmul.mubr.msk.bf16.gmra.mrb[32].mxu1 %vm540_vm1, %v7979_v27 }
  0xe1   : > { %6481 = vmatprep.mubr.msk.bf16.mxu1 %vm540_vm1, %v8329_v38  ;;  %v1287_v16 = vor.u32 %v1285_v5, %v1283_v15  ;;  %v8369_v52 = vsel %vm1127_vm2, %v1280_v35, %v1283_v15  ;;  %v1304_v5 = vrot.slane %v1302_v14, 1  ;;  %v1306_v35 = vshrl.u32 %v8072_v12, 16 }
  0xe2   : > { %v1323_v14 = vshll.u32 %v8097_v21, 16 }
  0xe3   : > { %v8373_v55 = vsel %vm1127_vm2, %v1287_v16, %v1290_v46 }
  0xe6   : > { %6776 = vmatmul.mubr.msk.bf16.vlgmr.msra.gmra.mrb[0].mxu0 %vm540_vm1, %v7782_v18  ;;  %v1292_v18 = vshrl.u32 %v8050_v0, 16 }
  0xe7   : > { %6840 = vmatpush3.bf16.msra.mxu0 %v4639_v61  ;;  %6779 = vmatprep.mubr.msk.bf16.mxu0 %vm540_vm1, %v7785_v19  ;;  %v1297_v19 = vrot.slane %v1295_v6, 1  ;;  %v1309_v61 = vshll.u32 %v8075_v31, 16  ;;  %v1316_v6 = vshll.u32 %v8094_v62, 16 }
  0xe8   : > { %6482 = vmatmul.mubr.msk.bf16.gmra.mrb[36].mxu1 %vm540_vm1, %v8342_v33  ;;  %7494 = vmatprep.subr.msk.bf16.mxu0 %vm637_vm0, %v8357_v59  ;;  %v1294_v32 = vor.u32 %v1292_v18, %v1290_v46  ;;  %v1308_v46 = vor.u32 %v1306_v35, %v1304_v5 }
  0xe9   : > { %6485 = vmatprep.mubr.msk.bf16.mxu1 %vm540_vm1, %v8346_v4  ;;  %v1301_v22 = vor.u32 %v1299_v24, %v1297_v19  ;;  %v1318_v24 = vrot.slane %v1316_v6, 1 }
  0xea   : > { %v8387_v15 = vsel %vm1127_vm2, %v1294_v32, %v1297_v19  ;;  %v1320_v32 = vshrl.u32 %v8094_v62, 16 }
  0xeb   : > { %v8391_v16 = vsel %vm1127_vm2, %v1301_v22, %v1304_v5  ;;  %v1325_v5 = vrot.slane %v1323_v14, 1 }
  0xec   : > { %v1322_v35 = vor.u32 %v1320_v32, %v1318_v24 }
  0xee   : > { %6780 = vmatmul.mubr.msk.bf16.gmra.mrb[4].mxu0 %vm540_vm1, %v7792_v23  ;;  %v1313_v23 = vshrl.u32 %v8075_v31, 16 }
  0xef   : > { %6783 = vmatprep.mubr.msk.bf16.mxu0 %vm540_vm1, %v7824_v41  ;;  %v1311_v41 = vrot.slane %v1309_v61, 1  ;;  %v1327_v61 = vshrl.u32 %v8097_v21, 16 }
  0xf0   : > { %6486 = vmatmul.mubr.msk.bf16.gmra.mrb[40].mxu1 %vm540_vm1, %v8369_v52 }
  0xf1   : > { %6489 = vmatprep.mubr.msk.bf16.mxu1 %vm540_vm1, %v8373_v55  ;;  %v1315_v18 = vor.u32 %v1313_v23, %v1311_v41  ;;  %v8405_v19 = vsel %vm1127_vm2, %v1308_v46, %v1311_v41  ;;  %v1329_v23 = vor.u32 %v1327_v61, %v1325_v5  ;;  %v1337_v41 = vshll.u32 %v8120_v13, 16 }
  0xf2   : > { %v8423_v46 = vsel %vm1127_vm2, %v1322_v35, %v1325_v5  ;;  %v8439_v61 = vcombine.low %v8269_v42, %v8269_v42 }
  0xf3   : > { %v8409_v22 = vsel %vm1127_vm2, %v1315_v18, %v1318_v24  ;;  %v1334_v18 = vshrl.u32 %v8117_v48, 16  ;;  %v1344_v24 = vshll.u32 %v8141_v26, 16  ;;  %v1339_v32 = vrot.slane %v1337_v41, 1 }
  0xf4   : > { %v1348_v41 = vshrl.u32 %v8141_v26, 16 }
  0xf5   : > { %v1346_v35 = vrot.slane %v1344_v24, 1 }
  0xf6   : > { %6784 = vmatmul.mubr.msk.bf16.gmra.mrb[8].mxu0 %vm540_vm1, %v7829_v45  ;;  %v1330_v45 = vshll.u32 %v8117_v48, 16 }
  0xf7   : > { %6787 = vmatprep.mubr.msk.bf16.mxu0 %vm540_vm1, %v7850_v53 }
  0xf8   : > { %6490 = vmatmul.mubr.msk.bf16.gmra.mrb[44].mxu1 %vm540_vm1, %v8387_v15  ;;  %v1332_v6 = vrot.slane %v1330_v45, 1 }
  0xf9   : > { %6493 = vmatprep.mubr.msk.bf16.mxu1 %vm540_vm1, %v8391_v16 }
  0xfa   : > { %v8427_v14 = vsel %vm1127_vm2, %v1329_v23, %v1332_v6  ;;  %v1336_v45 = vor.u32 %v1334_v18, %v1332_v6  ;;  %v314_v23 = vld [vmem:[%s7749_s9] sm:$0xe] }
  0xfb   : > { %9104 = vst [vmem:[#allocation48_spill] sm:$0xff] %v8427_v14 }
  0xfe   : > { %6788 = vmatmul.mubr.msk.bf16.gmra.mrb[12].mxu0 %vm540_vm1, %v7855_v57  ;;  %v1341_v57 = vshrl.u32 %v8120_v13, 16 }
  0xff   : > { %6791 = vmatprep.mubr.msk.bf16.mxu0 %vm540_vm1, %v7874_v1  ;;  %v8445_v1 = vsel %vm1127_vm2, %v1336_v45, %v1339_v32  ;;  %v9107_v45 = vld [vmem:[#allocation22_spill] sm:$0xff] }
 0x100   : > { %6494 = vmatmul.mubr.msk.bf16.gmra.mrb[48].mxu1 %vm540_vm1, %v8405_v19  ;;  %v1343_v5 = vor.u32 %v1341_v57, %v1339_v32  ;;  %v8459_v57 = vor.u32 %v1348_v41, %v1346_v35  ;;  %v9113_v41 = vld [vmem:[#allocation27_spill] sm:$0xff] }
 0x101   : > { %6497 = vmatprep.mubr.msk.bf16.mxu1 %vm540_vm1, %v8409_v22 }
 0x102   : > { %v8451_v6 = vsel %vm1127_vm2, %v1343_v5, %v1346_v35  ;;  %v9108_v5 = vld [vmem:[#allocation6_spill] sm:$0xff]  ;;  %v9111_v35 = vld [vmem:[#allocation25_spill] sm:$0xff] }
 0x103   : > { %9105 = vst [vmem:[#allocation49_spill] sm:$0xff] %v8451_v6 }
 0x106   : > { %6792 = vmatmul.mubr.msk.bf16.gmra.mrb[16].mxu0 %vm540_vm1, %v7879_v10  ;;  %v1352_v10 = vshll.u32 %v8439_v61, 16 }
 0x107   : > { %6795 = vmatprep.mubr.msk.bf16.mxu0 %vm540_vm1, %v7898_v25 }
 0x108   : > { %6498 = vmatmul.mubr.msk.bf16.gmra.mrb[52].mxu1 %vm540_vm1, %v8423_v46  ;;  %v1354_v42 = vrot.slane %v1352_v10, 1  ;;  %v9106_v10 = vrot.slane %v7765_v11, 1  ;;  %v9109_v11 = vld [vmem:[#allocation23_spill] sm:$0xff] }
 0x109   : > { %6501 = vmatprep.mubr.msk.bf16.mxu1 %vm540_vm1, %v8427_v14  ;;  %v5837_v14 = vcombine.low %v314_v23, %v7753_v7  ;;  %v1943_v7 = vrot.slane %v7759_v9, 1  ;;  %v2604_v9 = vsel %vm637_vm0, %v8176_v58, 0  ;;  %v9110_v58 = vld [vmem:[#allocation24_spill] sm:$0xff]  ;;  %v9112_v23 = vld [vmem:[#allocation26_spill] sm:$0xff] }
 0x10a   : > { %v1355_v24 = vsel %vm1127_vm2, %v8459_v57, %v1354_v42  ;;  %v9114_v42 = vld [vmem:[#allocation28_spill] sm:$0xff] }
 0x10b   : > { %v1942_v18 = vrot.slane %v5837_v14, 1  ;;  %v1946_v14 = vsel %vm1941_vm3, %v1943_v7, %v9106_v10  ;;  %v9119_v10 = vld [vmem:[#allocation33_spill] sm:$0xff] }
 0x10d   : > { %v1944_v32 = vsel %vm1941_vm3, %v1942_v18, %v1943_v7  ;;  %v9115_v18 = vld [vmem:[#allocation29_spill] sm:$0xff]  ;;  %v9116_v7 = vld [vmem:[#allocation30_spill] sm:$0xff] }
 0x10e   : > { %6796 = vmatmul.mubr.msk.bf16.gmra.mrb[20].mxu0 %vm540_vm1, %v7903_v29 }
 0x10f   : > { %6799 = vmatprep.mubr.msk.bf16.mxu0 %vm540_vm1, %v7929_v43 }
 0x110   : > { %6502 = vmatmul.mubr.msk.bf16.gmra.mrb[56].mxu1 %vm540_vm1, %v8445_v1 }
 0x111   : > { %6505 = vmatprep.mubr.msk.bf16.mxu1 %vm540_vm1, %v8451_v6 }
 0x116   : > { %6800 = vmatmul.mubr.msk.bf16.gmra.mrb[24].mxu0 %vm540_vm1, %v7934_v50 }
 0x117   : > { %6803 = vmatprep.mubr.msk.bf16.mxu0 %vm540_vm1, %v7955_v63 }
 0x118   : > { %6506 = vmatmul.mubr.msk.bf16.gmra.mrb[60].mxu1 %vm540_vm1, %v1355_v24  ;;  %v9117_v24 = vld [vmem:[#allocation31_spill] sm:$0xff] }
 0x119   : > { %6511 = vmatprep.mubr.msk.bf16.mxu1 %vm540_vm1, %v1944_v32  ;;  %v9118_v32 = vld [vmem:[#allocation32_spill] sm:$0xff] }
 0x11e   : > { %6804 = vmatmul.mubr.msk.bf16.gmra.mrb[28].mxu0 %vm540_vm1, %v7997_v34 }
 0x11f   : > { %6807 = vmatprep.mubr.msk.bf16.mxu0 %vm540_vm1, %v8000_v36 }
 0x120   : > { %6512 = vmatmul.mubr.msk.bf16.vlgmr.msra.gmra.mrb[0].mxu1 %vm540_vm1, %v1946_v14  ;;  %v310_v14 = vld [vmem:[%s7749_s9 + $0x114] sm:$0xf] }
 0x121   : > { %6576 = vmatpush3.bf16.msra.mxu1 %v2604_v9  ;;  %6515 = vmatprep.mubr.msk.bf16.mxu1 %vm540_vm1, %v9107_v45  ;;  %v8537_v9 = vcombine.low %v8298_v37, %v310_v14  ;;  %v8548_v45 = vld [vmem:[%s7749_s9 + $0x118] sm:$0xff]   ;;  %v5140_v37 = vsel %vm637_vm0, %v8357_v59, 0  ;;  %v9122_v59 = vld [vmem:[#allocation34_spill] sm:$0xff]  ;;  %v9126_v14 = vld [vmem:[#allocation36_spill] sm:$0xff] }
 0x122   : > { %7490 = vmatprep.subr.msk.bf16.mxu1 %vm637_vm0, %v9108_v5  ;;  %v9123_v5 = vld [vmem:[#allocation11_spill] sm:$0xff] }
 0x123   : > { %9120 = vst [vmem:[#allocation22_spill] sm:$0xff] %v8537_v9 }
 0x126   : > { %6808 = vmatmul.mubr.msk.bf16.gmra.mrb[32].mxu0 %vm540_vm1, %v8028_v51 }
 0x127   : > { %6811 = vmatprep.mubr.msk.bf16.mxu0 %vm540_vm1, %v8031_v54 }
 0x128   : > { %6516 = vmatmul.mubr.msk.bf16.gmra.mrb[4].mxu1 %vm540_vm1, %v9109_v11  ;;  %v9125_v11 = vld [vmem:[#allocation14_spill] sm:$0xff] }
 0x129   : > { %6519 = vmatprep.mubr.msk.bf16.mxu1 %vm540_vm1, %v9110_v58 }
 0x12e   : > { %6812 = vmatmul.mubr.msk.bf16.gmra.mrb[36].mxu0 %vm540_vm1, %v8050_v0 }
 0x12f   : > { %6815 = vmatprep.mubr.msk.bf16.mxu0 %vm540_vm1, %v8053_v3 }
 0x130   : > { %6520 = vmatmul.mubr.msk.bf16.gmra.mrb[8].mxu1 %vm540_vm1, %v9111_v35 }
 0x131   : > { %6523 = vmatprep.mubr.msk.bf16.mxu1 %vm540_vm1, %v9112_v23 }
 0x136   : > { %6816 = vmatmul.mubr.msk.bf16.gmra.mrb[40].mxu0 %vm540_vm1, %v8072_v12 }
 0x137   : > { %6819 = vmatprep.mubr.msk.bf16.mxu0 %vm540_vm1, %v8075_v31 }
 0x138   : > { %6524 = vmatmul.mubr.msk.bf16.gmra.mrb[12].mxu1 %vm540_vm1, %v9113_v41 }
 0x139   : > { %6527 = vmatprep.mubr.msk.bf16.mxu1 %vm540_vm1, %v9114_v42 }
 0x13e   : > { %6820 = vmatmul.mubr.msk.bf16.gmra.mrb[44].mxu0 %vm540_vm1, %v8094_v62 }
 0x13f   : > { %6823 = vmatprep.mubr.msk.bf16.mxu0 %vm540_vm1, %v8097_v21 }
 0x140   : > { %6528 = vmatmul.mubr.msk.bf16.gmra.mrb[16].mxu1 %vm540_vm1, %v9115_v18 }
 0x141   : > { %6531 = vmatprep.mubr.msk.bf16.mxu1 %vm540_vm1, %v9116_v7 }
 0x146   : > { %6824 = vmatmul.mubr.msk.bf16.gmra.mrb[48].mxu0 %vm540_vm1, %v8117_v48 }
 0x147   : > { %6827 = vmatprep.mubr.msk.bf16.mxu0 %vm540_vm1, %v8120_v13 }
 0x148   : > { %6532 = vmatmul.mubr.msk.bf16.gmra.mrb[20].mxu1 %vm540_vm1, %v9117_v24 }
 0x149   : > { %6535 = vmatprep.mubr.msk.bf16.mxu1 %vm540_vm1, %v9118_v32 }
 0x14e   : > { %6828 = vmatmul.mubr.msk.bf16.gmra.mrb[52].mxu0 %vm540_vm1, %v8141_v26 }
 0x14f   : > { %6831 = vmatprep.mubr.msk.bf16.mxu0 %vm540_vm1, %v8276_v20 }
 0x150   : > { %6536 = vmatmul.mubr.msk.bf16.gmra.mrb[24].mxu1 %vm540_vm1, %v9119_v10 }
 0x151   : > { %6539 = vmatprep.mubr.msk.bf16.mxu1 %vm540_vm1, %v8128_v44 }
 0x156   : > { %6832 = vmatmul.mubr.msk.bf16.gmra.mrb[56].mxu0 %vm540_vm1, %v8283_v17 }
 0x157   : > { %6835 = vmatprep.mubr.msk.bf16.mxu0 %vm540_vm1, %v8537_v9 }
 0x158   : > { %6540 = vmatmul.mubr.msk.bf16.gmra.mrb[28].mxu1 %vm540_vm1, %v8145_v2 }
 0x159   : > { %6543 = vmatprep.mubr.msk.bf16.mxu1 %vm540_vm1, %v8149_v28 }
 0x15e   : > { %6836 = vmatmul.mubr.msk.bf16.gmra.mrb[60].mxu0 %vm540_vm1, %v8548_v45 }
 0x15f   : > { %6841 = vmatprep.mubr.msk.bf16.mxu0 %vm540_vm1, %v7819_v39  ;;  %v9121_v39 = vld [vmem:[#allocation10_spill] sm:$0xff] }
 0x160   : > { %6544 = vmatmul.mubr.msk.bf16.gmra.mrb[32].mxu1 %vm540_vm1, %v8163_v8 }
 0x161   : > { %6547 = vmatprep.mubr.msk.bf16.mxu1 %vm540_vm1, %v8168_v40 }
 0x166   : > { %6842 = vmatmul.mubr.msk.bf16.vlgmr.msra.gmra.mrb[0].mxu0 %vm540_vm1, %v7835_v47  ;;  %v9124_v47 = vld [vmem:[#allocation35_spill] sm:$0xff] }
 0x167   : > { %6906 = vmatpush3.bf16.msra.mxu0 %v5140_v37  ;;  %6845 = vmatprep.mubr.msk.bf16.mxu0 %vm540_vm1, %v7839_v49  ;;  %v9127_v49 = vld [vmem:[#allocation15_spill] sm:$0xff]  ;;  %v9128_v37 = vld [vmem:[#allocation37_spill] sm:$0xff] }
 0x168   : > { %6548 = vmatmul.mubr.msk.bf16.gmra.mrb[36].mxu1 %vm540_vm1, %v8187_v30 }
 0x169   : > { %6551 = vmatprep.mubr.msk.bf16.mxu1 %vm540_vm1, %v8190_v60 }
 0x16e   : > { %6846 = vmatmul.mubr.msk.bf16.gmra.mrb[4].mxu0 %vm540_vm1, %v9121_v39  ;;  %v9129_v39 = vld [vmem:[#allocation16_spill] sm:$0xff] }
 0x16f   : > { %6849 = vmatprep.mubr.msk.bf16.mxu0 %vm540_vm1, %v9123_v5  ;;  %v9130_v5 = vld [vmem:[#allocation38_spill] sm:$0xff] }
 0x170   : > { %6552 = vmatmul.mubr.msk.bf16.gmra.mrb[40].mxu1 %vm540_vm1, %v8203_v56 }
 0x171   : > { %6555 = vmatprep.mubr.msk.bf16.mxu1 %vm540_vm1, %v9122_v59 }
 0x176   : > { %6850 = vmatmul.mubr.msk.bf16.gmra.mrb[8].mxu0 %vm540_vm1, %v9125_v11  ;;  %v9132_v11 = vld [vmem:[#allocation39_spill] sm:$0xff] }
 0x177   : > { %6853 = vmatprep.mubr.msk.bf16.mxu0 %vm540_vm1, %v9127_v49  ;;  %v9134_v49 = vld [vmem:[#allocation40_spill] sm:$0xff] }
 0x178   : > { %6556 = vmatmul.mubr.msk.bf16.gmra.mrb[44].mxu1 %vm540_vm1, %v9124_v47  ;;  %v9131_v47 = vld [vmem:[#allocation17_spill] sm:$0xff] }
 0x179   : > { %6559 = vmatprep.mubr.msk.bf16.mxu1 %vm540_vm1, %v9126_v14  ;;  %v9133_v14 = vld [vmem:[#allocation18_spill] sm:$0xff] }
 0x17e   : > { %6854 = vmatmul.mubr.msk.bf16.gmra.mrb[12].mxu0 %vm540_vm1, %v9129_v39  ;;  %v9136_v39 = vld [vmem:[#allocation42_spill] sm:$0xff] }
 0x17f   : > { %6857 = vmatprep.mubr.msk.bf16.mxu0 %vm540_vm1, %v9131_v47  ;;  %v9138_v47 = vld [vmem:[#allocation43_spill] sm:$0xff] }
 0x180   : > { %6560 = vmatmul.mubr.msk.bf16.gmra.mrb[48].mxu1 %vm540_vm1, %v9128_v37  ;;  %v9135_v37 = vld [vmem:[#allocation19_spill] sm:$0xff] }
 0x181   : > { %6563 = vmatprep.mubr.msk.bf16.mxu1 %vm540_vm1, %v9130_v5  ;;  %v9137_v5 = vld [vmem:[#allocation20_spill] sm:$0xff] }
 0x186   : > { %6858 = vmatmul.mubr.msk.bf16.gmra.mrb[16].mxu0 %vm540_vm1, %v9133_v14  ;;  %v9139_v14 = vld [vmem:[#allocation21_spill] sm:$0xff] }
 0x187   : > { %6861 = vmatprep.mubr.msk.bf16.mxu0 %vm540_vm1, %v9135_v37  ;;  %v7577_v37 = vld [vmem:[%s7749_s9 + $0x10] sm:$0xff]  }
 0x188   : > { %6564 = vmatmul.mubr.msk.bf16.gmra.mrb[52].mxu1 %vm540_vm1, %v9132_v11  ;;  %v2005_v11 = vrot.slane %v8439_v61, 1  ;;  %v7578_v61 = vld [vmem:[%s7749_s9 + $0x18] sm:$0xff]  }
 0x189   : > { %6567 = vmatprep.mubr.msk.bf16.mxu1 %vm540_vm1, %v9134_v49  ;;  %v9140_v49 = vld [vmem:[#allocation41_spill] sm:$0xff] }
 0x18a   : > { %v2006_v59 = vsel %vm1941_vm3, %v9140_v49, %v2005_v11  ;;  %v7581_v11 = vld [vmem:[%s7749_s9 + $0x30] sm:$0xff]   ;;  %v7582_v49 = vld [vmem:[%s7749_s9 + $0x38] sm:$0xff]  }
 0x18e   : > { %6862 = vmatmul.mubr.msk.bf16.gmra.mrb[20].mxu0 %vm540_vm1, %v9137_v5  ;;  %v9141_v5 = vld [vmem:[#allocation7_spill] sm:$0xff] }
 0x18f   : > { %6865 = vmatprep.mubr.msk.bf16.mxu0 %vm540_vm1, %v9139_v14  ;;  %v7583_v14 = vld [vmem:[%s7749_s9 + $0x40] sm:$0xff]  }
 0x190   : > { %6568 = vmatmul.mubr.msk.bf16.gmra.mrb[56].mxu1 %vm540_vm1, %v9136_v39 }
 0x191   : > { %6571 = vmatprep.mubr.msk.bf16.mxu1 %vm540_vm1, %v9138_v47 }
 0x196   : > { %6866 = vmatmul.mubr.msk.bf16.gmra.mrb[24].mxu0 %vm540_vm1, %v7979_v27  ;;  %v7579_v27 = vld [vmem:[%s7749_s9 + $0x20] sm:$0xff]  }
 0x197   : > { %6869 = vmatprep.mubr.msk.bf16.mxu0 %vm540_vm1, %v8329_v38 }
 0x198   : > { %6572 = vmatmul.mubr.msk.bf16.gmra.mrb[60].mxu1 %vm540_vm1, %v2006_v59  ;;  %v7580_v59 = vld [vmem:[%s7749_s9 + $0x28] sm:$0xff]  }
 0x199   : > { %6577 = vmatprep.mubr.msk.bf16.mxu1 %vm540_vm1, %v7577_v37  ;;  %v9142_v37 = vld [vmem:[#allocation8_spill] sm:$0xff] }
 0x19e   : > { %6870 = vmatmul.mubr.msk.bf16.gmra.mrb[28].mxu0 %vm540_vm1, %v8342_v33 }
 0x19f   : > { %6873 = vmatprep.mubr.msk.bf16.mxu0 %vm540_vm1, %v8346_v4 }
 0x1a0   : > { %6578 = vmatmul.mubr.msk.bf16.vlgmr.msra.gmra.mrb[0].mxu1 %vm540_vm1, %v7578_v61  ;;  %v9143_v61 = vld [vmem:[#allocation9_spill] sm:$0xff] }
 0x1a1   : > { %6972 = vmatpush3.bf16.msra.mxu1 %v9141_v5  ;;  %6581 = vmatprep.mubr.msk.bf16.mxu1 %vm540_vm1, %v7579_v27  ;;  %v9144_v5 = vld [vmem:[#allocation12_spill] sm:$0xff] }
 0x1a2   : > { %v9145_v27 = vld [vmem:[#allocation48_spill] sm:$0xff] }
 0x1a6   : > { %6874 = vmatmul.mubr.msk.bf16.gmra.mrb[32].mxu0 %vm540_vm1, %v8369_v52 }
 0x1a7   : > { %6877 = vmatprep.mubr.msk.bf16.mxu0 %vm540_vm1, %v8373_v55 }
 0x1a8   : > { %6582 = vmatmul.mubr.msk.bf16.gmra.mrb[4].mxu1 %vm540_vm1, %v7580_v59  ;;  %v3092_v59 = vshll.u32 %v8276_v20, 16 }
 0x1a9   : > { %6585 = vmatprep.mubr.msk.bf16.mxu1 %vm540_vm1, %v7581_v11  ;;  %v3096_v11 = vshrl.u32 %v8276_v20, 16 }
 0x1ae   : > { %6878 = vmatmul.mubr.msk.bf16.gmra.mrb[36].mxu0 %vm540_vm1, %v8387_v15 }
 0x1af   : > { %6881 = vmatprep.mubr.msk.bf16.mxu0 %vm540_vm1, %v8391_v16 }
 0x1b0   : > { %6586 = vmatmul.mubr.msk.bf16.gmra.mrb[8].mxu1 %vm540_vm1, %v7582_v49  ;;  %v9146_v49 = vld [vmem:[#allocation13_spill] sm:$0xff] }
 0x1b1   : > { %6589 = vmatprep.mubr.msk.bf16.mxu1 %vm540_vm1, %v7583_v14  ;;  %v3094_v14 = vrot.slane %v3092_v59, 1  ;;  %v4617_v59 = vshll.u32 %v8548_v45, 16 }
 0x1b3   : > { %v8673_v47 = vsel %vm1127_vm2, %v8459_v57, %v3094_v14 }
 0x1b4   : > { %9147 = vst [vmem:[#allocation6_spill] sm:$0xff] %v8673_v47 }
 0x1b6   : > { %6882 = vmatmul.mubr.msk.bf16.gmra.mrb[40].mxu0 %vm540_vm1, %v8405_v19 }
 0x1b7   : > { %6885 = vmatprep.mubr.msk.bf16.mxu0 %vm540_vm1, %v8409_v22 }
 0x1b8   : > { %6590 = vmatmul.mubr.msk.bf16.gmra.mrb[12].mxu1 %vm540_vm1, %v9142_v37  ;;  %v3098_v37 = vor.u32 %v3096_v11, %v3094_v14 }
 0x1b9   : > { %6593 = vmatprep.mubr.msk.bf16.mxu1 %vm540_vm1, %v7850_v53  ;;  %v3099_v53 = vshll.u32 %v8283_v17, 16 }
 0x1be   : > { %6886 = vmatmul.mubr.msk.bf16.gmra.mrb[44].mxu0 %vm540_vm1, %v8423_v46 }
 0x1bf   : > { %6889 = vmatprep.mubr.msk.bf16.mxu0 %vm540_vm1, %v9145_v27 }
 0x1c0   : > { %6594 = vmatmul.mubr.msk.bf16.gmra.mrb[16].mxu1 %vm540_vm1, %v9143_v61  ;;  %v3101_v61 = vrot.slane %v3099_v53, 1  ;;  %v8692_v53 = vld [vmem:[%s7749_s9 + $0x120] ss:$0 sps:$4 sm:$0x11]  }
 0x1c1   : > { %6597 = vmatprep.mubr.msk.bf16.mxu1 %vm540_vm1, %v9144_v5  ;;  %v4610_v5 = vshll.u32 %v8537_v9, 16 }
 0x1c2   : > { %v8677_v39 = vsel %vm1127_vm2, %v3098_v37, %v3101_v61  ;;  %v4619_v37 = vrot.slane %v4617_v59, 1 }
 0x1c3   : > { %v4612_v57 = vrot.slane %v4610_v5, 1 }
 0x1c6   : > { %6890 = vmatmul.mubr.msk.bf16.gmra.mrb[48].mxu0 %vm540_vm1, %v8445_v1 }
 0x1c7   : > { %6893 = vmatprep.mubr.msk.bf16.mxu0 %vm540_vm1, %v8451_v6 }
 0x1c8   : > { %6598 = vmatmul.mubr.msk.bf16.gmra.mrb[20].mxu1 %vm540_vm1, %v9146_v49  ;;  %v3103_v49 = vshrl.u32 %v8283_v17, 16 }
 0x1c9   : > { %6601 = vmatprep.mubr.msk.bf16.mxu1 %vm540_vm1, %v7898_v25  ;;  %v4614_v25 = vshrl.u32 %v8537_v9, 16 }
 0x1ca   : > { %v8689_v11 = vor.u32 %v3103_v49, %v3101_v61 }
 0x1cb   : > { %v4616_v14 = vor.u32 %v4614_v25, %v4612_v57 }
 0x1cc   : > { %v4613_v9 = vsel %vm1127_vm2, %v8689_v11, %v4612_v57 }
 0x1cd   : > { %v4620_v6 = vsel %vm1127_vm2, %v4616_v14, %v4619_v37 }
 0x1ce   : > { %6894 = vmatmul.mubr.msk.bf16.gmra.mrb[52].mxu0 %vm540_vm1, %v8673_v47  ;;  %v4625_v47 = vshll.u32 %v8692_v53, 16 }
 0x1cf   : > { %6897 = vmatprep.mubr.msk.bf16.mxu0 %vm540_vm1, %v8677_v39 }
 0x1d0   : > { %6602 = vmatmul.mubr.msk.bf16.gmra.mrb[24].mxu1 %vm540_vm1, %v7903_v29  ;;  %v4621_v29 = vshrl.u32 %v8548_v45, 16  ;;  %v4627_v61 = vrot.slane %v4625_v47, 1 }
 0x1d1   : > { %6605 = vmatprep.mubr.msk.bf16.mxu1 %vm540_vm1, %v7929_v43 }
 0x1d2   : > { %v4623_v43 = vor.u32 %v4621_v29, %v4619_v37 }
 0x1d4   : > { %v4628_v5 = vsel %vm1127_vm2, %v4623_v43, %v4627_v61 }
 0x1d6   : > { %6898 = vmatmul.mubr.msk.bf16.gmra.mrb[56].mxu0 %vm540_vm1, %v4613_v9 }
 0x1d7   : > { %6901 = vmatprep.mubr.msk.bf16.mxu0 %vm540_vm1, %v4620_v6 }
 0x1d8   : > { %6606 = vmatmul.mubr.msk.bf16.gmra.mrb[28].mxu1 %vm540_vm1, %v7934_v50  ;;  %v9150_v50 = vld [vmem:[#allocation36_spill] sm:$0xff] }
 0x1d9   : > { %6609 = vmatprep.mubr.msk.bf16.mxu1 %vm540_vm1, %v7955_v63  ;;  %v9151_v63 = vld [vmem:[#allocation37_spill] sm:$0xff] }
 0x1de   : > { %6902 = vmatmul.mubr.msk.bf16.gmra.mrb[60].mxu0 %vm540_vm1, %v4628_v5 }
 0x1df   : > { %6907 = vmatprep.mubr.msk.bf16.mxu0 %vm540_vm1, %v9110_v58 }
 0x1e0   : > { %6610 = vmatmul.mubr.msk.bf16.gmra.mrb[32].mxu1 %vm540_vm1, %v7997_v34  ;;  %v9153_v34 = vld [vmem:[#allocation39_spill] sm:$0xff] }
 0x1e1   : > { %6613 = vmatprep.mubr.msk.bf16.mxu1 %vm540_vm1, %v8000_v36  ;;  %v9154_v36 = vld [vmem:[#allocation40_spill] sm:$0xff] }
 0x1e6   : > { %6908 = vmatmul.mubr.msk.bf16.vlgmr.msra.gmra.mrb[0].mxu0 %vm540_vm1, %v9111_v35 }
 0x1e7   : > { %6911 = vmatprep.mubr.msk.bf16.mxu0 %vm540_vm1, %v9112_v23 }
 0x1e8   : > { %6614 = vmatmul.mubr.msk.bf16.gmra.mrb[36].mxu1 %vm540_vm1, %v8028_v51  ;;  %v9156_v51 = vld [vmem:[#allocation49_spill] sm:$0xff] }
 0x1e9   : > { %6617 = vmatprep.mubr.msk.bf16.mxu1 %vm540_vm1, %v8031_v54  ;;  %v9157_v54 = vld [vmem:[#allocation43_spill] sm:$0xff] }
 0x1ee   : > { %6912 = vmatmul.mubr.msk.bf16.gmra.mrb[4].mxu0 %vm540_vm1, %v9113_v41 }
 0x1ef   : > { %6915 = vmatprep.mubr.msk.bf16.mxu0 %vm540_vm1, %v9114_v42 }
 0x1f0   : > { %6618 = vmatmul.mubr.msk.bf16.gmra.mrb[40].mxu1 %vm540_vm1, %v8050_v0  ;;  %v9158_v0 = vld [vmem:[#allocation46_spill] sm:$0xff] }
 0x1f1   : > { %6621 = vmatprep.mubr.msk.bf16.mxu1 %vm540_vm1, %v8053_v3  ;;  %v3107_v3 = vshll.u32 %v9158_v0, 16 }
 0x1f6   : > { %6916 = vmatmul.mubr.msk.bf16.gmra.mrb[8].mxu0 %vm540_vm1, %v9115_v18 }
 0x1f7   : > { %6919 = vmatprep.mubr.msk.bf16.mxu0 %vm540_vm1, %v9116_v7 }
 0x1f8   : > { %6622 = vmatmul.mubr.msk.bf16.gmra.mrb[44].mxu1 %vm540_vm1, %v8072_v12  ;;  %v9160_v12 = vld [vmem:[#allocation45_spill] sm:$0xff] }
 0x1f9   : > { %6625 = vmatprep.mubr.msk.bf16.mxu1 %vm540_vm1, %v8075_v31  ;;  %v9161_v31 = vld [vmem:[#allocation47_spill] sm:$0xff] }
 0x1fe   : > { %6920 = vmatmul.mubr.msk.bf16.gmra.mrb[12].mxu0 %vm540_vm1, %v9117_v24 }
 0x1ff   : > { %6923 = vmatprep.mubr.msk.bf16.mxu0 %vm540_vm1, %v9118_v32 }
 0x200   : > { %6626 = vmatmul.mubr.msk.bf16.gmra.mrb[48].mxu1 %vm540_vm1, %v8094_v62  ;;  %v9162_v62 = vld [vmem:[#allocation22_spill] sm:$0xff] }
 0x201   : > { %6629 = vmatprep.mubr.msk.bf16.mxu1 %vm540_vm1, %v8097_v21  ;;  %v5124_v21 = vrot.slane %v9162_v62, 1 }
 0x206   : > { %6924 = vmatmul.mubr.msk.bf16.gmra.mrb[16].mxu0 %vm540_vm1, %v9119_v10 }
 0x207   : > { %6927 = vmatprep.mubr.msk.bf16.mxu0 %vm540_vm1, %v8128_v44  ;;  %v9155_v44 = vld [vmem:[#allocation42_spill] sm:$0xff] }
 0x208   : > { %6630 = vmatmul.mubr.msk.bf16.gmra.mrb[52].mxu1 %vm540_vm1, %v8117_v48  ;;  %v5126_v48 = vrot.slane %v8548_v45, 1 }
 0x209   : > { %6633 = vmatprep.mubr.msk.bf16.mxu1 %vm540_vm1, %v8120_v13  ;;  %v9159_v13 = vld [vmem:[#allocation6_spill] sm:$0xff] }
 0x20e   : > { %6928 = vmatmul.mubr.msk.bf16.gmra.mrb[20].mxu0 %vm540_vm1, %v8145_v2  ;;  %v9148_v2 = vld [vmem:[#allocation34_spill] sm:$0xff] }
 0x20f   : > { %6931 = vmatprep.mubr.msk.bf16.mxu0 %vm540_vm1, %v8149_v28  ;;  %v9152_v28 = vld [vmem:[#allocation38_spill] sm:$0xff] }
 0x210   : > { %6634 = vmatmul.mubr.msk.bf16.gmra.mrb[56].mxu1 %vm540_vm1, %v8141_v26 }
 0x211   : > { %6637 = vmatprep.mubr.msk.bf16.mxu1 %vm540_vm1, %v8276_v20 }
 0x216   : > { %6932 = vmatmul.mubr.msk.bf16.gmra.mrb[24].mxu0 %vm540_vm1, %v8163_v8  ;;  %v9163_v8 = vld [vmem:[#allocation44_spill] sm:$0xff] }
 0x217   : > { %6935 = vmatprep.mubr.msk.bf16.mxu0 %vm540_vm1, %v8168_v40  ;;  %v5125_v40 = vsel %vm1941_vm3, %v9163_v8, %v5124_v21 }
 0x218   : > { %6638 = vmatmul.mubr.msk.bf16.gmra.mrb[60].mxu1 %vm540_vm1, %v8283_v17  ;;  %v9149_v17 = vld [vmem:[#allocation35_spill] sm:$0xff] }
 0x219   : > { %6675 = vmatprep.mubr.msk.bf16.mxu1 %vm540_vm1, %v8329_v38 }
 0x21e   : > { %6936 = vmatmul.mubr.msk.bf16.gmra.mrb[28].mxu0 %vm540_vm1, %v8187_v30  ;;  %v5127_v30 = vsel %vm1941_vm3, %v5124_v21, %v5126_v48 }
 0x21f   : > { %6939 = vmatprep.mubr.msk.bf16.mxu0 %vm540_vm1, %v8190_v60  ;;  %v5128_v60 = vrot.slane %v8692_v53, 1  ;;  %v8858_v53 = vld [vmem:[%s8991_s2] ss:$0 sm:$0xff] }
 0x220   : > { %6676 = vmatmul.mubr.msk.bf16.vlgmr.msra.gmra.mrb[32].mxu1 %vm540_vm1, %v8342_v33 }
 0x221   : > { %6679 = vmatprep.mubr.msk.bf16.mxu1 %vm540_vm1, %v8346_v4 }
 0x226   : > { %6940 = vmatmul.mubr.msk.bf16.gmra.mrb[32].mxu0 %vm540_vm1, %v8203_v56  ;;  %v5129_v56 = vsel %vm1941_vm3, %v5126_v48, %v5128_v60 }
 0x227   : > { %6943 = vmatprep.mubr.msk.bf16.mxu0 %vm540_vm1, %v9148_v2 }
 0x228   : > { %6680 = vmatmul.mubr.msk.bf16.gmra.mrb[36].mxu1 %vm540_vm1, %v8369_v52 }
 0x229   : > { %6683 = vmatprep.mubr.msk.bf16.mxu1 %vm540_vm1, %v8373_v55 }
 0x22e   : > { %6944 = vmatmul.mubr.msk.bf16.gmra.mrb[36].mxu0 %vm540_vm1, %v9149_v17 }
 0x22f   : > { %6947 = vmatprep.mubr.msk.bf16.mxu0 %vm540_vm1, %v9150_v50 }
 0x230   : > { %6684 = vmatmul.mubr.msk.bf16.gmra.mrb[40].mxu1 %vm540_vm1, %v8387_v15 }
 0x231   : > { %6687 = vmatprep.mubr.msk.bf16.mxu1 %vm540_vm1, %v8391_v16 }
 0x236   : > { %6948 = vmatmul.mubr.msk.bf16.gmra.mrb[40].mxu0 %vm540_vm1, %v9151_v63 }
 0x237   : > { %6951 = vmatprep.mubr.msk.bf16.mxu0 %vm540_vm1, %v9152_v28 }
 0x238   : > { %6688 = vmatmul.mubr.msk.bf16.gmra.mrb[44].mxu1 %vm540_vm1, %v8405_v19 }
 0x239   : > { %6691 = vmatprep.mubr.msk.bf16.mxu1 %vm540_vm1, %v8409_v22 }
 0x23e   : > { %6952 = vmatmul.mubr.msk.bf16.gmra.mrb[44].mxu0 %vm540_vm1, %v9153_v34 }
 0x23f   : > { %6955 = vmatprep.mubr.msk.bf16.mxu0 %vm540_vm1, %v9154_v36 }
 0x240   : > { %6692 = vmatmul.mubr.msk.bf16.gmra.mrb[48].mxu1 %vm540_vm1, %v8423_v46 }
 0x241   : > { %6695 = vmatprep.mubr.msk.bf16.mxu1 %vm540_vm1, %v9145_v27 }
 0x246   : > { %6956 = vmatmul.mubr.msk.bf16.gmra.mrb[48].mxu0 %vm540_vm1, %v9155_v44 }
 0x247   : > { %6959 = vmatprep.mubr.msk.bf16.mxu0 %vm540_vm1, %v9157_v54 }
 0x248   : > { %6696 = vmatmul.mubr.msk.bf16.gmra.mrb[52].mxu1 %vm540_vm1, %v8445_v1  ;;  %v3109_v1 = vrot.slane %v3107_v3, 1 }
 0x249   : > { %6699 = vmatprep.mubr.msk.bf16.mxu1 %vm540_vm1, %v9156_v51 }
 0x24a   : > { %v3110_v26 = vsel %vm1127_vm2, %v8689_v11, %v3109_v1 }
 0x24e   : > { %6960 = vmatmul.mubr.msk.bf16.gmra.mrb[52].mxu0 %vm540_vm1, %v9160_v12 }
 0x24f   : > { %6963 = vmatprep.mubr.msk.bf16.mxu0 %vm540_vm1, %v9161_v31 }
 0x250   : > { %6700 = vmatmul.mubr.msk.bf16.gmra.mrb[56].mxu1 %vm540_vm1, %v9159_v13 }
 0x251   : > { %6703 = vmatprep.mubr.msk.bf16.mxu1 %vm540_vm1, %v8677_v39 }
 0x256   : > { %6964 = vmatmul.mubr.msk.bf16.gmra.mrb[56].mxu0 %vm540_vm1, %v5125_v40 }
 0x257   : > { %6967 = vmatprep.mubr.msk.bf16.mxu0 %vm540_vm1, %v5127_v30 }
 0x258   : > { %6704 = vmatmul.mubr.msk.bf16.gmra.mrb[60].mxu1 %vm540_vm1, %v3110_v26 }
 0x25e   : > { %6968 = vmatmul.mubr.msk.bf16.gmra.mrb[60].mxu0 %vm540_vm1, %v5129_v56 }
 0x273   : > { %v6579_v38 = vpop.f32.mrb[0].mxu1 }
 0x274   : > { %v2640_v20 = vpop.f32.mrb[1].mxu1 }
 0x275   : > { %v6580_v33 = vpop.f32.mrb[2].mxu1  ;;  %v6973_v14 = vadd.f32 %v8858_v53, %v2640_v20 }
 0x276   : > { %v2643_v4 = vpop.f32.mrb[3].mxu1 }
 0x277   : > { %v6975_v43 = vadd.f32 %v8858_v53, %v2643_v4 }
 0x27b   : > { %v6583_v52 = vpop.f32.mrb[4].mxu1 }
 0x27c   : > { %v2656_v55 = vpop.f32.mrb[5].mxu1 }
 0x27d   : > { %v6584_v15 = vpop.f32.mrb[6].mxu1  ;;  %v6977_v28 = vadd.f32 %v8858_v53, %v2656_v55 }
 0x27e   : > { %v2659_v16 = vpop.f32.mrb[7].mxu1 }
 0x27f   : > { %v6979_v44 = vadd.f32 %v8858_v53, %v2659_v16 }
 0x283   : > { %v6587_v19 = vpop.f32.mrb[8].mxu1 }
 0x284   : > { %v2672_v22 = vpop.f32.mrb[9].mxu1 }
 0x285   : > { %v6588_v46 = vpop.f32.mrb[10].mxu1  ;;  %v6981_v1 = vadd.f32 %v8858_v53, %v2672_v22 }
 0x286   : > { %v2675_v6 = vpop.f32.mrb[11].mxu1 }
 0x287   : > { %v6983_v21 = vadd.f32 %v8858_v53, %v2675_v6 }
 0x28b   : > { %v6591_v58 = vpop.f32.mrb[12].mxu1 }
 0x28c   : > { %v2688_v35 = vpop.f32.mrb[13].mxu1 }
 0x28d   : > { %v6592_v23 = vpop.f32.mrb[14].mxu1  ;;  %v6985_v56 = vadd.f32 %v8858_v53, %v2688_v35 }
 0x28e   : > { %v2691_v41 = vpop.f32.mrb[15].mxu1 }
 0x28f   : > { %v6987_v33 = vadd.f32 %v8858_v53, %v2691_v41 }
 0x293   : > { %v6595_v42 = vpop.f32.mrb[16].mxu1 }
 0x294   : > { %v8839_v18 = vpop.f32.mrb[17].mxu1 }
 0x295   : > { %v6596_v7 = vpop.f32.mrb[18].mxu1  ;;  %v6989_v22 = vadd.f32 %v8858_v53, %v8839_v18 }
 0x296   : > { %v8841_v24 = vpop.f32.mrb[19].mxu1 }
 0x297   : > { %v6991_v58 = vadd.f32 %v8858_v53, %v8841_v24 }
 0x29b   : > { %v6599_v32 = vpop.f32.mrb[20].mxu1 }
 0x29c   : > { %v8843_v10 = vpop.f32.mrb[21].mxu1 }
 0x29d   : > { %v6600_v9 = vpop.f32.mrb[22].mxu1 }
 0x29e   : > { %v8845_v45 = vpop.f32.mrb[23].mxu1  ;;  %v6993_v9 = vadd.f32 %v8858_v53, %v8843_v10 }
 0x2a3   : > { %v6603_v39 = vpop.f32.mrb[24].mxu1 }
 0x2a4   : > { %v8847_v47 = vpop.f32.mrb[25].mxu1 }
 0x2a5   : > { %v6604_v27 = vpop.f32.mrb[26].mxu1 }
 0x2a6   : > { %v8849_v49 = vpop.f32.mrb[27].mxu1  ;;  %v6995_v27 = vadd.f32 %v8858_v53, %v8845_v45 }
 0x2ab   : > { %v6607_v25 = vpop.f32.mrb[28].mxu1 }
 0x2ac   : > { %v8851_v59 = vpop.f32.mrb[29].mxu1 }
 0x2ad   : > { %v6608_v57 = vpop.f32.mrb[30].mxu1 }
 0x2ae   : > { %v8853_v11 = vpop.f32.mrb[31].mxu1 }
 0x2b9   : > { %v6909_v37 = vpop.f32.mrb[0].mxu0 }
 0x2ba   : > { %v5176_v29 = vpop.f32.mrb[1].mxu0 }
 0x2bb   : > { %v6974_v61 = vadd.f32 %v6973_v14, %v5176_v29  ;;  %v6910_v5 = vpop.f32.mrb[2].mxu0 }
 0x2bc   : > { %v5179_v2 = vpop.f32.mrb[3].mxu0  ;;  %v6999_v5 = vadd.f32 %v8858_v53, %v8849_v49  ;;  %v7003_v49 = vadd.f32 %v8858_v53, %v8853_v11 }
 0x2bd   : > { %v5591_v17 = vmax.f32 %v6974_v61, 0.0  ;;  %v6976_v50 = vadd.f32 %v6975_v43, %v5179_v2  ;;  %v6997_v43 = vadd.f32 %v8858_v53, %v8847_v47 }
 0x2bf   : > { %5623 = vst [vmem:[%s8865_s6] sm:$0xff] %v5591_v17  ;;  %v5592_v63 = vmax.f32 %v6976_v50, 0.0 }
 0x2c1   : > { %5624 = vst [vmem:[%s8865_s6 + $0x8] sm:$0xff] %v5592_v63  ;;  %v6913_v34 = vpop.f32.mrb[4].mxu0 }
 0x2c2   : > { %v5192_v36 = vpop.f32.mrb[5].mxu0 }
 0x2c3   : > { %v6978_v51 = vadd.f32 %v6977_v28, %v5192_v36  ;;  %v6914_v54 = vpop.f32.mrb[6].mxu0  ;;  %v7001_v36 = vadd.f32 %v8858_v53, %v8851_v59 }
 0x2c4   : > { %v5195_v0 = vpop.f32.mrb[7].mxu0 }
 0x2c5   : > { %v5593_v3 = vmax.f32 %v6978_v51, 0.0  ;;  %v6980_v13 = vadd.f32 %v6979_v44, %v5195_v0 }
 0x2c7   : > { %5625 = vst [vmem:[%s8865_s6 + $0x10] sm:$0xff] %v5593_v3  ;;  %v5594_v12 = vmax.f32 %v6980_v13, 0.0 }
 0x2c9   : > { %5626 = vst [vmem:[%s8865_s6 + $0x18] sm:$0xff] %v5594_v12  ;;  %v6917_v31 = vpop.f32.mrb[8].mxu0 }
 0x2ca   : > { %v5208_v62 = vpop.f32.mrb[9].mxu0 }
 0x2cb   : > { %v6982_v48 = vadd.f32 %v6981_v1, %v5208_v62  ;;  %v6918_v26 = vpop.f32.mrb[10].mxu0 }
 0x2cc   : > { %v5211_v8 = vpop.f32.mrb[11].mxu0 }
 0x2cd   : > { %v5595_v40 = vmax.f32 %v6982_v48, 0.0  ;;  %v6984_v30 = vadd.f32 %v6983_v21, %v5211_v8 }
 0x2cf   : > { %5627 = vst [vmem:[%s8865_s6 + $0x20] sm:$0xff] %v5595_v40  ;;  %v5596_v60 = vmax.f32 %v6984_v30, 0.0 }
 0x2d1   : > { %5628 = vst [vmem:[%s8865_s6 + $0x28] sm:$0xff] %v5596_v60  ;;  %v6921_v38 = vpop.f32.mrb[12].mxu0 }
 0x2d2   : > { %v5224_v20 = vpop.f32.mrb[13].mxu0 }
 0x2d3   : > { %v6986_v4 = vadd.f32 %v6985_v56, %v5224_v20  ;;  %v6922_v52 = vpop.f32.mrb[14].mxu0 }
 0x2d4   : > { %v5227_v55 = vpop.f32.mrb[15].mxu0 }
 0x2d5   : > { %v5597_v15 = vmax.f32 %v6986_v4, 0.0  ;;  %v6988_v16 = vadd.f32 %v6987_v33, %v5227_v55 }
 0x2d7   : > { %5629 = vst [vmem:[%s8865_s6 + $0x30] sm:$0xff] %v5597_v15  ;;  %v5598_v19 = vmax.f32 %v6988_v16, 0.0 }
 0x2d9   : > { %5630 = vst [vmem:[%s8865_s6 + $0x38] sm:$0xff] %v5598_v19  ;;  %v6925_v46 = vpop.f32.mrb[16].mxu0 }
 0x2da   : > { %v5240_v6 = vpop.f32.mrb[17].mxu0 }
 0x2db   : > { %v6990_v35 = vadd.f32 %v6989_v22, %v5240_v6  ;;  %v6926_v23 = vpop.f32.mrb[18].mxu0 }
 0x2dc   : > { %v5243_v41 = vpop.f32.mrb[19].mxu0 }
 0x2dd   : > { %v5599_v42 = vmax.f32 %v6990_v35, 0.0  ;;  %v6992_v7 = vadd.f32 %v6991_v58, %v5243_v41 }
 0x2df   : > { %5631 = vst [vmem:[%s8865_s6 + $0x40] sm:$0xff] %v5599_v42  ;;  %v5600_v32 = vmax.f32 %v6992_v7, 0.0 }
 0x2e1   : > { %5632 = vst [vmem:[%s8865_s6 + $0x48] sm:$0xff] %v5600_v32  ;;  %v6929_v18 = vpop.f32.mrb[20].mxu0 }
 0x2e2   : > { %v5256_v39 = vpop.f32.mrb[21].mxu0 }
 0x2e3   : > { %v6994_v25 = vadd.f32 %v6993_v9, %v5256_v39  ;;  %v6930_v24 = vpop.f32.mrb[22].mxu0 }
 0x2e4   : > { %v5259_v57 = vpop.f32.mrb[23].mxu0 }
 0x2e5   : > { %v5601_v14 = vmax.f32 %v6994_v25, 0.0  ;;  %v6996_v37 = vadd.f32 %v6995_v27, %v5259_v57 }
 0x2e7   : > { %5633 = vst [vmem:[%s8865_s6 + $0x50] sm:$0xff] %v5601_v14  ;;  %v5602_v29 = vmax.f32 %v6996_v37, 0.0 }
 0x2e9   : > { %5634 = vst [vmem:[%s8865_s6 + $0x58] sm:$0xff] %v5602_v29  ;;  %v6933_v10 = vpop.f32.mrb[24].mxu0 }
 0x2ea   : > { %v5272_v61 = vpop.f32.mrb[25].mxu0 }
 0x2eb   : > { %v6998_v2 = vadd.f32 %v6997_v43, %v5272_v61  ;;  %v6934_v45 = vpop.f32.mrb[26].mxu0 }
 0x2ec   : > { %v5275_v17 = vpop.f32.mrb[27].mxu0 }
 0x2ed   : > { %v5603_v50 = vmax.f32 %v6998_v2, 0.0  ;;  %v7000_v63 = vadd.f32 %v6999_v5, %v5275_v17 }
 0x2ef   : > { %5635 = vst [vmem:[%s8865_s6 + $0x60] sm:$0xff] %v5603_v50  ;;  %v5604_v28 = vmax.f32 %v7000_v63, 0.0 }
 0x2f1   : > { %5636 = vst [vmem:[%s8865_s6 + $0x68] sm:$0xff] %v5604_v28  ;;  %v6937_v47 = vpop.f32.mrb[28].mxu0 }
 0x2f2   : > { %v5288_v51 = vpop.f32.mrb[29].mxu0 }
 0x2f3   : > { %v6677_v34 = vpop.f32.mrb[32].mxu1  ;;  %v7002_v0 = vadd.f32 %v7001_v36, %v5288_v51  ;;  %v6938_v3 = vpop.f32.mrb[30].mxu0 }
 0x2f4   : > { %v3285_v44 = vpop.f32.mrb[33].mxu1  ;;  %v5291_v12 = vpop.f32.mrb[31].mxu0 }
 0x2f5   : > { %v6678_v54 = vpop.f32.mrb[34].mxu1  ;;  %v5605_v1 = vmax.f32 %v7002_v0, 0.0  ;;  %v7004_v31 = vadd.f32 %v7003_v49, %v5291_v12  ;;  %v7005_v59 = vadd.f32 %v8858_v53, %v3285_v44 }
 0x2f6   : > { %v3288_v13 = vpop.f32.mrb[35].mxu1 }
 0x2f7   : > { %5637 = vst [vmem:[%s8865_s6 + $0x70] sm:$0xff] %v5605_v1  ;;  %v5606_v62 = vmax.f32 %v7004_v31, 0.0  ;;  %v7007_v11 = vadd.f32 %v8858_v53, %v3288_v13 }
 0x2f9   : > { %5638 = vst [vmem:[%s8865_s6 + $0x78] sm:$0xff] %v5606_v62  ;;  %v6941_v48 = vpop.f32.mrb[32].mxu0 }
 0x2fa   : > { %v5304_v8 = vpop.f32.mrb[33].mxu0 }
 0x2fb   : > { %v6681_v21 = vpop.f32.mrb[36].mxu1  ;;  %v7006_v30 = vadd.f32 %v7005_v59, %v5304_v8  ;;  %v6942_v60 = vpop.f32.mrb[34].mxu0 }
 0x2fc   : > { %v3301_v26 = vpop.f32.mrb[37].mxu1  ;;  %v5307_v38 = vpop.f32.mrb[35].mxu0 }
 0x2fd   : > { %v6682_v40 = vpop.f32.mrb[38].mxu1  ;;  %v5607_v20 = vmax.f32 %v7006_v30, 0.0  ;;  %v7008_v33 = vadd.f32 %v7007_v11, %v5307_v38  ;;  %v7009_v55 = vadd.f32 %v8858_v53, %v3301_v26 }
 0x2fe   : > { %v3304_v56 = vpop.f32.mrb[39].mxu1 }
 0x2ff   : > { %5639 = vst [vmem:[%s8865_s6 + $0x80] sm:$0xff] %v5607_v20  ;;  %v5608_v4 = vmax.f32 %v7008_v33, 0.0  ;;  %v7011_v46 = vadd.f32 %v8858_v53, %v3304_v56 }
 0x301   : > { %5640 = vst [vmem:[%s8865_s6 + $0x88] sm:$0xff] %v5608_v4  ;;  %v6945_v15 = vpop.f32.mrb[36].mxu0 }
 0x302   : > { %v5320_v19 = vpop.f32.mrb[37].mxu0 }
 0x303   : > { %v6685_v52 = vpop.f32.mrb[40].mxu1  ;;  %v7010_v6 = vadd.f32 %v7009_v55, %v5320_v19  ;;  %v6946_v58 = vpop.f32.mrb[38].mxu0 }
 0x304   : > { %v3317_v16 = vpop.f32.mrb[41].mxu1  ;;  %v5323_v23 = vpop.f32.mrb[39].mxu0 }
 0x305   : > { %v6686_v22 = vpop.f32.mrb[42].mxu1  ;;  %v5609_v41 = vmax.f32 %v7010_v6, 0.0  ;;  %v7012_v42 = vadd.f32 %v7011_v46, %v5323_v23  ;;  %v7013_v9 = vadd.f32 %v8858_v53, %v3317_v16 }
 0x306   : > { %v3320_v35 = vpop.f32.mrb[43].mxu1 }
 0x307   : > { %5641 = vst [vmem:[%s8865_s6 + $0x90] sm:$0xff] %v5609_v41  ;;  %v5610_v7 = vmax.f32 %v7012_v42, 0.0  ;;  %v7015_v24 = vadd.f32 %v8858_v53, %v3320_v35 }
 0x309   : > { %5642 = vst [vmem:[%s8865_s6 + $0x98] sm:$0xff] %v5610_v7  ;;  %v6949_v18 = vpop.f32.mrb[40].mxu0 }
 0x30a   : > { %v5336_v27 = vpop.f32.mrb[41].mxu0 }
 0x30b   : > { %v6689_v32 = vpop.f32.mrb[44].mxu1  ;;  %v7014_v57 = vadd.f32 %v7013_v9, %v5336_v27  ;;  %v6950_v14 = vpop.f32.mrb[42].mxu0 }
 0x30c   : > { %v3333_v39 = vpop.f32.mrb[45].mxu1  ;;  %v5339_v29 = vpop.f32.mrb[43].mxu0 }
 0x30d   : > { %v6690_v25 = vpop.f32.mrb[46].mxu1  ;;  %v5611_v43 = vmax.f32 %v7014_v57, 0.0  ;;  %v7016_v10 = vadd.f32 %v7015_v24, %v5339_v29  ;;  %v7017_v2 = vadd.f32 %v8858_v53, %v3333_v39 }
 0x30e   : > { %v3336_v37 = vpop.f32.mrb[47].mxu1 }
 0x30f   : > { %5643 = vst [vmem:[%s8865_s6 + $0xa0] sm:$0xff] %v5611_v43  ;;  %v5612_v61 = vmax.f32 %v7016_v10, 0.0  ;;  %v7019_v28 = vadd.f32 %v8858_v53, %v3336_v37 }
 0x311   : > { %5644 = vst [vmem:[%s8865_s6 + $0xa8] sm:$0xff] %v5612_v61  ;;  %v6953_v45 = vpop.f32.mrb[44].mxu0 }
 0x312   : > { %v5352_v50 = vpop.f32.mrb[45].mxu0 }
 0x313   : > { %v6693_v5 = vpop.f32.mrb[48].mxu1  ;;  %v7018_v34 = vadd.f32 %v7017_v2, %v5352_v50  ;;  %v6954_v36 = vpop.f32.mrb[46].mxu0 }
 0x314   : > { %v3349_v17 = vpop.f32.mrb[49].mxu1  ;;  %v5355_v44 = vpop.f32.mrb[47].mxu0 }
 0x315   : > { %v6694_v63 = vpop.f32.mrb[50].mxu1  ;;  %v5613_v51 = vmax.f32 %v7018_v34, 0.0  ;;  %v7020_v54 = vadd.f32 %v7019_v28, %v5355_v44  ;;  %v7021_v3 = vadd.f32 %v8858_v53, %v3349_v17 }
 0x316   : > { %v3352_v47 = vpop.f32.mrb[51].mxu1 }
 0x317   : > { %5645 = vst [vmem:[%s8865_s6 + $0xb0] sm:$0xff] %v5613_v51  ;;  %v5614_v49 = vmax.f32 %v7020_v54, 0.0  ;;  %v7023_v62 = vadd.f32 %v8858_v53, %v3352_v47 }
 0x319   : > { %5646 = vst [vmem:[%s8865_s6 + $0xb8] sm:$0xff] %v5614_v49  ;;  %v6957_v13 = vpop.f32.mrb[48].mxu0 }
 0x31a   : > { %v5368_v1 = vpop.f32.mrb[49].mxu0 }
 0x31b   : > { %v6697_v0 = vpop.f32.mrb[52].mxu1  ;;  %v7022_v21 = vadd.f32 %v7021_v3, %v5368_v1  ;;  %v6958_v59 = vpop.f32.mrb[50].mxu0 }
 0x31c   : > { %v3365_v12 = vpop.f32.mrb[53].mxu1  ;;  %v5371_v26 = vpop.f32.mrb[51].mxu0 }
 0x31d   : > { %v6698_v31 = vpop.f32.mrb[54].mxu1  ;;  %v5615_v8 = vmax.f32 %v7022_v21, 0.0  ;;  %v7024_v40 = vadd.f32 %v7023_v62, %v5371_v26  ;;  %v7025_v60 = vadd.f32 %v8858_v53, %v3365_v12 }
 0x31e   : > { %v3368_v48 = vpop.f32.mrb[55].mxu1 }
 0x31f   : > { %5647 = vst [vmem:[%s8865_s6 + $0xc0] sm:$0xff] %v5615_v8  ;;  %v5616_v11 = vmax.f32 %v7024_v40, 0.0  ;;  %v7027_v4 = vadd.f32 %v8858_v53, %v3368_v48 }
 0x321   : > { %5648 = vst [vmem:[%s8865_s6 + $0xc8] sm:$0xff] %v5616_v11  ;;  %v6961_v56 = vpop.f32.mrb[52].mxu0 }
 0x322   : > { %v5384_v20 = vpop.f32.mrb[53].mxu0 }
 0x323   : > { %v6701_v30 = vpop.f32.mrb[56].mxu1  ;;  %v7026_v52 = vadd.f32 %v7025_v60, %v5384_v20  ;;  %v6962_v55 = vpop.f32.mrb[54].mxu0 }
 0x324   : > { %v3381_v38 = vpop.f32.mrb[57].mxu1  ;;  %v5387_v16 = vpop.f32.mrb[55].mxu0 }
 0x325   : > { %v6702_v33 = vpop.f32.mrb[58].mxu1  ;;  %v5617_v19 = vmax.f32 %v7026_v52, 0.0  ;;  %v7028_v22 = vadd.f32 %v7027_v4, %v5387_v16  ;;  %v7029_v58 = vadd.f32 %v8858_v53, %v3381_v38 }
 0x326   : > { %v3384_v15 = vpop.f32.mrb[59].mxu1 }
 0x327   : > { %5649 = vst [vmem:[%s8865_s6 + $0xd0] sm:$0xff] %v5617_v19  ;;  %v5618_v46 = vmax.f32 %v7028_v22, 0.0  ;;  %v7031_v7 = vadd.f32 %v8858_v53, %v3384_v15 }
 0x329   : > { %5650 = vst [vmem:[%s8865_s6 + $0xd8] sm:$0xff] %v5618_v46  ;;  %v6965_v35 = vpop.f32.mrb[56].mxu0 }
 0x32a   : > { %v5400_v41 = vpop.f32.mrb[57].mxu0 }
 0x32b   : > { %v6705_v6 = vpop.f32.mrb[60].mxu1  ;;  %v7030_v32 = vadd.f32 %v7029_v58, %v5400_v41  ;;  %v6966_v9 = vpop.f32.mrb[58].mxu0 }
 0x32c   : > { %v3397_v23 = vpop.f32.mrb[61].mxu1  ;;  %v5403_v39 = vpop.f32.mrb[59].mxu0 }
 0x32d   : > { %v6706_v42 = vpop.f32.mrb[62].mxu1  ;;  %v5619_v27 = vmax.f32 %v7030_v32, 0.0  ;;  %v7032_v25 = vadd.f32 %v7031_v7, %v5403_v39  ;;  %v7033_v57 = vadd.f32 %v8858_v53, %v3397_v23 }
 0x32e   : > { %v3400_v18 = vpop.f32.mrb[63].mxu1 }
 0x32f   : > { %5651 = vst [vmem:[%s8865_s6 + $0xe0] sm:$0xff] %v5619_v27  ;;  %v5620_v24 = vmax.f32 %v7032_v25, 0.0  ;;  %v7035_v29 = vadd.f32 %v8858_v53, %v3400_v18 }
 0x331   : > { %5652 = vst [vmem:[%s8865_s6 + $0xe8] sm:$0xff] %v5620_v24  ;;  %v6969_v14 = vpop.f32.mrb[60].mxu0 }
 0x332   : > { %v5416_v37 = vpop.f32.mrb[61].mxu0 }
 0x333   : > { %v7034_v43 = vadd.f32 %v7033_v57, %v5416_v37  ;;  %v6970_v10 = vpop.f32.mrb[62].mxu0 }
 0x334   : > { %v5419_v61 = vpop.f32.mrb[63].mxu0 }
 0x335   : > { %v5621_v5 = vmax.f32 %v7034_v43, 0.0  ;;  %v7036_v2 = vadd.f32 %v7035_v29, %v5419_v61 }
 0x337   : > { %5653 = vst [vmem:[%s8865_s6 + $0xf0] sm:$0xff] %v5621_v5  ;;  %v5622_v53 = vmax.f32 %v7036_v2, 0.0 }
 0x339   : > { %5654 = vst [vmem:[%s8865_s6 + $0xf8] sm:$0xff] %v5622_v53 }
 0x33a   : > { %7597 = shalt.err (!%p7594_p3)
}
 0x33b   : > { %s7598_s25 = scalar_lea.hbm %s8940_s11, 4096  ;;  %s7602_s28 = scalar_lea.hbm %s8992_s3, 8192 }
 0x33c   : > { %p7599_p4 = scmp.ne.s32.totalorder %s8940_s11, %s7598_s25  ;;  %p7603_p9 = scmp.lt.u32.totalorder %s8940_s11, %s8992_s3 }
 0x33d   : > { %p7604_p10 = scmp.lt.u32.totalorder %s7602_s28, %s7598_s25  ;;  %p7606_p12 = scmp.lt.u32.totalorder %s7598_s25, %s8940_s11 }
 0x33e   : > { %p7600_p7 = pnand %p7599_p4, %p7709_p5 }
 0x33f   : > { %p7605_p11 = por %p7604_p10, %p7603_p9 }
 0x340   : > { %p7601_p8 = pneg %p7600_p7 }
 0x341   : > { %p7607_p13 = por %p7606_p12, %p7605_p11 }
 0x343   : > { %p7608_p0 = pnand %p7607_p13, %p7601_p8 }
 0x345   : > { %7611 = shalt.err (!%p7608_p0)
}
 0x346   : > { %s7649_s4 = smov 128   ;;  %s7650_s5 = smov 8  }
 0x347   : > { %7496 = dma.vmem_to_hbm [thread:$0]  (%p7709_p5), %s8942_s8, 4096, %s8940_s11, %s8948_s17, %s7649_s4, %s7649_s4, %s7650_s5  }
 0x348 PF: > { %p7502_p1 = scmp.ge.s32.totalorder %s7646_s15, 2  ;;  %s5684_s6 = sand.u32 1, %s7634_s12  }
 0x349   : > { %s5685_s7 = scalar_lea.sflag [#allocation4], %s5684_s6 }
 0x34a   : > { %p7499_p2 = pnand %p7502_p1, %p7713_p6 }
 0x34c   : > { %7629 = dma.done.wait (!%p7499_p2), %s5685_s7, 4096  }
 0x34d   : > { %7631 = vsyncadd (!%p7499_p2), %s5685_s7, 4294963200  ;;  %p13_p3 = scmp.ge.s32.totalorder %s7696_s18, 4   ;;  %s9164_s12 = smov %s7638_s13 }
 0x34e   : > { %s9165_s13 = smov %s7642_s14  ;;  %s9166_s14 = smov %s7707_s21 }
 0x34f   : > { %s9167_s15 = smov %s7696_s18  ;;  %15 = sbr.rel (!%p13_p3) target bundleno = 3 (0x3), region = 75 }
 0x356   :  { %5690 = vsyncpa [#allocation4], 1 }
 0x357   :  { %5692 = vsyncpa [#allocation4 + $0x1], 1 }

</bundles_post_ra>
